<compile_context>
chip_gen: v6e
topology: v6e:2x2x1
jax: 0.10.0
libtpu: 0.0.40
codegen_flags: <defaults>
</compile_context>

<pallas_src>
import functools

import jax
import jax.numpy as jnp
from jax.experimental import pallas as pl
from jax.experimental.pallas import tpu as pltpu

# Tile sizes. Worst-case VMEM footprint with double buffering:
#   x (256x512 bf16) + w (512x256 bf16) + out (256x256 bf16/f32), each x2
#   buffers, + one f32 acc (256x256) ~= 1.8 MiB -> fits 64 MiB (v7x) and
#   128 MiB (v5e/v6e) with huge headroom.
_TM, _TN, _TK = 256, 256, 512


def _round_up(x, m):
    return ((x + m - 1) // m) * m


def _pad_and_tile(dim, max_tile, align):
    """Returns (padded_dim, tile) with tile dividing padded_dim, tile <= max_tile."""
    aligned = _round_up(max(dim, align), align)
    if aligned <= max_tile:
        return aligned, aligned
    return _round_up(dim, max_tile), max_tile


# ----------------------------------------------------------------------------
# Pallas kernel: tiled (X @ W) with fused per-channel affine (+ReLU) epilogue.
# ----------------------------------------------------------------------------
def _mm_affine_kernel(x_ref, w_ref, s_ref, b_ref, o_ref, acc_ref, *, relu):
    @pl.when(pl.program_id(2) == 0)
    def _init():
        acc_ref[...] = jnp.zeros_like(acc_ref)

    # bf16 x bf16 -> f32 accumulate on the MXU.
    acc_ref[...] += jnp.dot(x_ref[...], w_ref[...],
                            preferred_element_type=jnp.float32)

    @pl.when(pl.program_id(2) == pl.num_programs(2) - 1)
    def _finalize():
        # Per-output-channel affine (folded BN / bias) + optional ReLU, all f32.
        y = acc_ref[...] * s_ref[...] + b_ref[...]
        if relu:
            y = jnp.maximum(y, 0.0)
        o_ref[...] = y.astype(o_ref.dtype)


def _prepare_matmul_operand(w_mat, scale, shift):
    """One-time prep: pad / cast a weight matrix and its per-channel affine."""
    K, N = w_mat.shape
    Kp, tk = _pad_and_tile(K, _TK, 128)
    Np, tn = _pad_and_tile(N, _TN, 128)
    wp = jnp.pad(w_mat.astype(jnp.bfloat16), ((0, Kp - K), (0, Np - N)))
    sp = jnp.pad(scale.astype(jnp.float32), (0, Np - N)).reshape(1, Np)
    bp = jnp.pad(shift.astype(jnp.float32), (0, Np - N)).reshape(1, Np)
    return {"w": wp, "scale": sp, "shift": bp,
            "K": K, "N": N, "Kp": Kp, "Np": Np, "tk": tk, "tn": tn}


def fused_matmul_affine(x, prep, *, relu, out_dtype=jnp.bfloat16):
    """relu_opt((x @ w) * scale + shift) with a tiled Pallas matmul.

    x: (M, K) activation (any float dtype; cast to bf16 for the MXU).
    prep: pre-padded bf16 weights + f32 affine params.
    """
    M, K = x.shape
    assert K == prep["K"], (K, prep["K"])
    Kp, Np, tk, tn = prep["Kp"], prep["Np"], prep["tk"], prep["tn"]
    Mp, tm = _pad_and_tile(M, _TM, 16)

    xp = jnp.pad(x.astype(jnp.bfloat16), ((0, Mp - M), (0, Kp - K)))
    grid = (Mp // tm, Np // tn, Kp // tk)

    out = pl.pallas_call(
        functools.partial(_mm_affine_kernel, relu=relu),
        out_shape=jax.ShapeDtypeStruct((Mp, Np), out_dtype),
        grid_spec=pltpu.PrefetchScalarGridSpec(
            num_scalar_prefetch=0,
            grid=grid,
            in_specs=[
                pl.BlockSpec((tm, tk), lambda i, j, k: (i, k)),
                pl.BlockSpec((tk, tn), lambda i, j, k: (k, j)),
                pl.BlockSpec((1, tn), lambda i, j, k: (0, j)),
                pl.BlockSpec((1, tn), lambda i, j, k: (0, j)),
            ],
            out_specs=pl.BlockSpec((tm, tn), lambda i, j, k: (i, j)),
            scratch_shapes=[pltpu.VMEM((tm, tn), jnp.float32)],
        ),
        compiler_params=pltpu.CompilerParams(
            dimension_semantics=("parallel", "parallel", "arbitrary"),
            vmem_limit_bytes=32 * 1024 * 1024,
        ),
        cost_estimate=pl.CostEstimate(
            flops=2 * Mp * Kp * Np,
            transcendentals=0,
            bytes_accessed=(Mp * Kp * 2 + Kp * Np * 2
                            + Mp * Np * jnp.dtype(out_dtype).itemsize
                            + 2 * Np * 4),
        ),
    )(xp, prep["w"], prep["scale"], prep["shift"])
    return out[:M, :prep["N"]]


# ----------------------------------------------------------------------------
# im2col glue (plain JAX, runs in bf16): NHWC -> (N*OH*OW, KH*KW*C),
# column ordering (kh, kw, c) to match the prepared weight layout.
# ----------------------------------------------------------------------------
def _im2col(x_nhwc, kernel, stride, padding):
    n, h, w, c = x_nhwc.shape
    xp = jnp.pad(x_nhwc, ((0, 0), (padding, padding), (padding, padding), (0, 0)))
    oh = (h + 2 * padding - kernel) // stride + 1
    ow = (w + 2 * padding - kernel) // stride + 1
    patches = []
    for di in range(kernel):
        for dj in range(kernel):
            patches.append(
                xp[:, di:di + stride * oh:stride, dj:dj + stride * ow:stride, :])
    cols = jnp.stack(patches, axis=3)                 # (N, OH, OW, KH*KW, C)
    cols = cols.reshape(n * oh * ow, kernel * kernel * c)
    return cols, oh, ow


# ----------------------------------------------------------------------------
# Parameter construction (deterministic, synthetic) + one-time preparation.
# ----------------------------------------------------------------------------
def calc_output_size(img_dim, kernel, stride=1, padding=0):
    return int((img_dim - kernel + 2 * padding) / stride + 1)


def init_facecnn_params(key, label_count, img_dim, base_filter):
    filter_sizes = [1 * base_filter, 2 * base_filter, 4 * base_filter,
                    6 * base_filter, 8 * base_filter, 10 * base_filter]
    out_size = calc_output_size(img_dim[0], 5, 2, 2)
    out_size = calc_output_size(out_size, 5, 2, 2)
    out_size = calc_output_size(out_size, 3, 2, 1)
    out_size = calc_output_size(out_size, 3, 2, 1)
    final_layer_size = filter_sizes[3] * out_size * out_size

    conv_cfg = [  # (in_ch, out_ch, kernel, stride, padding)
        (3, filter_sizes[0], 5, 2, 2),
        (filter_sizes[0], filter_sizes[1], 5, 2, 2),
        (filter_sizes[1], filter_sizes[2], 3, 2, 1),
        (filter_sizes[2], filter_sizes[3], 3, 2, 1),
    ]

    params = {"convs": [], "fc": [], "cfg": conv_cfg,
              "final_layer_size": final_layer_size, "out_size": out_size}
    for (ic, oc, k, s, p) in conv_cfg:
        key, k1, k2, k3, k4 = jax.random.split(key, 5)
        params["convs"].append({
            "w": jax.random.normal(k1, (oc, ic, k, k), jnp.float32) * 0.05,
            "b": jax.random.normal(k2, (oc,), jnp.float32) * 0.05,
            "bn_gamma": 1.0 + 0.01 * jax.random.normal(k3, (oc,), jnp.float32),
            "bn_beta": 0.01 * jax.random.normal(k4, (oc,), jnp.float32),
            "bn_mean": jnp.zeros((oc,), jnp.float32),   # eval-mode running stats
            "bn_var": jnp.ones((oc,), jnp.float32),
        })

    key, k1, k2, k3, k4 = jax.random.split(key, 5)
    params["fc"].append({
        "w": jax.random.normal(k1, (512, final_layer_size), jnp.float32) * 0.02,
        "b": jax.random.normal(k2, (512,), jnp.float32) * 0.02,
    })
    params["fc"].append({
        "w": jax.random.normal(k3, (label_count, 512), jnp.float32) * 0.02,
        "b": jax.random.normal(k4, (label_count,), jnp.float32) * 0.02,
    })
    return params


def prepare_params(params, eps=1e-5):
    """Hoists all weight transposes, BN folds, bf16 casts, K/N padding and the
    flatten-order permutation out of the forward pass (run once)."""
    prepared = {"convs": [], "fc": [], "cfg": params["cfg"]}
    for layer, (ic, oc, k, s, p) in zip(params["convs"], params["cfg"]):
        # (OC, IC, KH, KW) -> (KH, KW, IC, OC) -> (KH*KW*IC, OC): matches im2col.
        w_mat = jnp.transpose(layer["w"], (2, 3, 1, 0)).reshape(k * k * ic, oc)
        # Fold Conv bias + eval-mode BatchNorm into per-channel scale/shift.
        scale = layer["bn_gamma"] / jnp.sqrt(layer["bn_var"] + eps)
        shift = scale * (layer["b"] - layer["bn_mean"]) + layer["bn_beta"]
        prepared["convs"].append(_prepare_matmul_operand(w_mat, scale, shift))

    fc1, fc2 = params["fc"]
    # fc1 expects PyTorch NCHW flatten order (c*H*W + h*W + w); our activation
    # is NHWC.  Permute fc1's input columns once here so the forward can flatten
    # the NHWC activation directly (no per-forward transpose).
    oc_last = params["cfg"][-1][1]
    hw = params["out_size"]
    w1 = fc1["w"]                                   # (512, oc_last*hw*hw), NCHW order
    w1_nhwc = (w1.reshape(512, oc_last, hw, hw)
                 .transpose(0, 2, 3, 1)
                 .reshape(512, hw * hw * oc_last))  # columns now in (h, w, c) order
    prepared["fc"].append(_prepare_matmul_operand(
        w1_nhwc.T, jnp.ones_like(fc1["b"]), fc1["b"]))
    prepared["fc"].append(_prepare_matmul_operand(
        fc2["w"].T, jnp.ones_like(fc2["b"]), fc2["b"]))
    return prepared


# ----------------------------------------------------------------------------
# Forward pass.
# ----------------------------------------------------------------------------
def facecnn_forward(prepared, x_nchw):
    """x_nchw: (N, 3, H, W) float32  ->  (N, label_count) float32."""
    # NCHW -> NHWC, cast to bf16 ONCE; all intermediate activations stay bf16.
    x = jnp.transpose(x_nchw, (0, 2, 3, 1)).astype(jnp.bfloat16)

    for prep, (ic, oc, k, s, p) in zip(prepared["convs"], prepared["cfg"]):
        n = x.shape[0]
        cols, oh, ow = _im2col(x, k, s, p)          # (N*OH*OW, k*k*ic) bf16
        y = fused_matmul_affine(cols, prep, relu=True, out_dtype=jnp.bfloat16)
        x = y.reshape(n, oh, ow, oc)

    # Flatten directly in NHWC order; fc1 weights were permuted to match.
    n, oh, ow, oc = x.shape
    flat = x.reshape(n, oh * ow * oc)

    h = fused_matmul_affine(flat, prepared["fc"][0], relu=True,
                            out_dtype=jnp.bfloat16)
    out = fused_matmul_affine(h, prepared["fc"][1], relu=False,
                              out_dtype=jnp.float32)
    return out


# ----------------------------------------------------------------------------
if __name__ == "__main__":
    key = jax.random.PRNGKey(0)
    key, pkey, xkey = jax.random.split(key, 3)

    LABEL_COUNT = 5
    IMG_DIM = (32, 32)        # small spatial size consistent with the module
    BASE_FILTER = 8
    BATCH = 2

    params = init_facecnn_params(pkey, LABEL_COUNT, IMG_DIM, BASE_FILTER)
    prepared = prepare_params(params)     # one-time weight preprocessing
    x = jax.random.normal(xkey, (BATCH, 3, IMG_DIM[0], IMG_DIM[1]), jnp.float32)

    # jit the forward with the prepared weights closed over, so the im2col /
    # pad / reshape glue fuses and the six pallas_calls are scheduled together.
    forward_fn = jax.jit(functools.partial(facecnn_forward, prepared))

    out = forward_fn(x)
    out = jax.block_until_ready(out)
    assert out.shape == (BATCH, LABEL_COUNT), out.shape
    assert bool(jnp.all(jnp.isfinite(out))), "non-finite output"
    print("KERNEL_OK")
</pallas_src>

<mosaic_0001>
module attributes {stable_mosaic.version = 11 : i64} {
  func.func @_mm_affine_kernel(%arg0: i32, %arg1: i32, %arg2: i32, %arg3: memref<256x128xbf16, #tpu.memory_space<vmem>>, %arg4: memref<128x128xbf16, #tpu.memory_space<vmem>>, %arg5: memref<1x128xf32, #tpu.memory_space<vmem>>, %arg6: memref<1x128xf32, #tpu.memory_space<vmem>>, %arg7: memref<256x128xbf16, #tpu.memory_space<vmem>>, %arg8: memref<256x128xf32, #tpu.memory_space<vmem>>) attributes {dimension_semantics = [#tpu.dimension_semantics<parallel>, #tpu.dimension_semantics<parallel>, #tpu.dimension_semantics<arbitrary>], iteration_bounds = array<i64: 2, 1, 1>, scalar_prefetch = 0 : i64, scratch_operands = 1 : i64, tpu.core_type = #tpu.core_type<tc>, window_params = [{transform_indices = @transform_0, window_bounds = array<i64: 256, 128>}, {transform_indices = @transform_1, window_bounds = array<i64: 128, 128>}, {transform_indices = @transform_2, window_bounds = array<i64: 1, 128>}, {transform_indices = @transform_3, window_bounds = array<i64: 1, 128>}, {transform_indices = @transform_4, window_bounds = array<i64: 256, 128>}]} {
    %c0_i32 = arith.constant 0 : i32
    %0 = arith.cmpi eq, %arg2, %c0_i32 : i32
    %1 = arith.extui %0 : i1 to i32
    %c0_i32_0 = arith.constant 0 : i32
    %2 = arith.cmpi ne, %1, %c0_i32_0 : i32
    scf.if %2 {
      %cst_10 = arith.constant 0.000000e+00 : f32
      %12 = vector.broadcast %cst_10 : f32 to vector<256x128xf32>
      %c0_11 = arith.constant 0 : index
      %c0_12 = arith.constant 0 : index
      %13 = vector.load %arg8[%c0_11, %c0_12] : memref<256x128xf32, #tpu.memory_space<vmem>>, vector<256x128xf32>
      tpu.vector_store %arg8[%c0_11, %c0_12], %12 {strides = array<i32>} : memref<256x128xf32, #tpu.memory_space<vmem>>, vector<256x128xf32>,
    } else {
    }
    %c0 = arith.constant 0 : index
    %c0_1 = arith.constant 0 : index
    %3 = vector.load %arg8[%c0, %c0_1] : memref<256x128xf32, #tpu.memory_space<vmem>>, vector<256x128xf32>
    %c0_2 = arith.constant 0 : index
    %c0_3 = arith.constant 0 : index
    %4 = vector.load %arg3[%c0_2, %c0_3] : memref<256x128xbf16, #tpu.memory_space<vmem>>, vector<256x128xbf16>
    %c0_4 = arith.constant 0 : index
    %c0_5 = arith.constant 0 : index
    %5 = vector.load %arg4[%c0_4, %c0_5] : memref<128x128xbf16, #tpu.memory_space<vmem>>, vector<128x128xbf16>
    %cst = arith.constant dense<0.000000e+00> : vector<256x128xf32>
    %6 = tpu.matmul %4, %5, %cst {dimension_numbers = #tpu.dot_dimension_numbers<[1], [0], [0], [1], [0, 0, 1, 1], [], []>} : vector<256x128xbf16>, vector<128x128xbf16>, vector<256x128xf32> -> vector<256x128xf32>
    %7 = arith.addf %3, %6 : vector<256x128xf32>
    %c0_6 = arith.constant 0 : index
    %c0_7 = arith.constant 0 : index
    %8 = vector.load %arg8[%c0_6, %c0_7] : memref<256x128xf32, #tpu.memory_space<vmem>>, vector<256x128xf32>
    tpu.vector_store %arg8[%c0_6, %c0_7], %7 {strides = array<i32>} : memref<256x128xf32, #tpu.memory_space<vmem>>, vector<256x128xf32>,
    %c0_i32_8 = arith.constant 0 : i32
    %9 = arith.cmpi eq, %arg2, %c0_i32_8 : i32
    %10 = arith.extui %9 : i1 to i32
    %c0_i32_9 = arith.constant 0 : i32
    %11 = arith.cmpi ne, %10, %c0_i32_9 : i32
    scf.if %11 {
      %c0_10 = arith.constant 0 : index
      %c0_11 = arith.constant 0 : index
      %12 = vector.load %arg8[%c0_10, %c0_11] : memref<256x128xf32, #tpu.memory_space<vmem>>, vector<256x128xf32>
      %c0_12 = arith.constant 0 : index
      %c0_13 = arith.constant 0 : index
      %13 = vector.load %arg5[%c0_12, %c0_13] : memref<1x128xf32, #tpu.memory_space<vmem>>, vector<1x128xf32>
      %14 = vector.broadcast %13 : vector<1x128xf32> to vector<256x128xf32>
      %15 = arith.mulf %12, %14 : vector<256x128xf32>
      %c0_14 = arith.constant 0 : index
      %c0_15 = arith.constant 0 : index
      %16 = vector.load %arg6[%c0_14, %c0_15] : memref<1x128xf32, #tpu.memory_space<vmem>>, vector<1x128xf32>
      %17 = vector.broadcast %16 : vector<1x128xf32> to vector<256x128xf32>
      %18 = arith.addf %15, %17 : vector<256x128xf32>
      %cst_16 = arith.constant 0.000000e+00 : f32
      %19 = vector.broadcast %cst_16 : f32 to vector<256x128xf32>
      %20 = arith.maximumf %18, %19 : vector<256x128xf32>
      %21 = arith.truncf %20 : vector<256x128xf32> to vector<256x128xbf16>
      %c0_17 = arith.constant 0 : index
      %c0_18 = arith.constant 0 : index
      %22 = vector.load %arg7[%c0_17, %c0_18] : memref<256x128xbf16, #tpu.memory_space<vmem>>, vector<256x128xbf16>
      tpu.vector_store %arg7[%c0_17, %c0_18], %21 {strides = array<i32>} : memref<256x128xbf16, #tpu.memory_space<vmem>>, vector<256x128xbf16>,
    } else {
    }
    return
  }
  func.func @transform_0(%arg0: i32, %arg1: i32, %arg2: i32) -> (i32, i32) {
    %c0_i32 = arith.constant 0 : i32
    return %arg0, %arg2 : i32, i32
  }
  func.func @transform_1(%arg0: i32, %arg1: i32, %arg2: i32) -> (i32, i32) {
    %c0_i32 = arith.constant 0 : i32
    return %arg2, %arg1 : i32, i32
  }
  func.func @transform_2(%arg0: i32, %arg1: i32, %arg2: i32) -> (i32, i32) {
    %c0_i32 = arith.constant 0 : i32
    %c0_i32_0 = arith.constant 0 : i32
    return %c0_i32, %arg1 : i32, i32
  }
  func.func @transform_3(%arg0: i32, %arg1: i32, %arg2: i32) -> (i32, i32) {
    %c0_i32 = arith.constant 0 : i32
    %c0_i32_0 = arith.constant 0 : i32
    return %c0_i32, %arg1 : i32, i32
  }
  func.func @transform_4(%arg0: i32, %arg1: i32, %arg2: i32) -> (i32, i32) {
    %c0_i32 = arith.constant 0 : i32
    return %arg0, %arg1 : i32, i32
  }
}

module attributes {stable_mosaic.version = 11 : i64} {
  func.func @_mm_affine_kernel(%arg0: i32, %arg1: i32, %arg2: i32, %arg3: memref<128x256xbf16, #tpu.memory_space<vmem>>, %arg4: memref<256x128xbf16, #tpu.memory_space<vmem>>, %arg5: memref<1x128xf32, #tpu.memory_space<vmem>>, %arg6: memref<1x128xf32, #tpu.memory_space<vmem>>, %arg7: memref<128x128xbf16, #tpu.memory_space<vmem>>, %arg8: memref<128x128xf32, #tpu.memory_space<vmem>>) attributes {dimension_semantics = [#tpu.dimension_semantics<parallel>, #tpu.dimension_semantics<parallel>, #tpu.dimension_semantics<arbitrary>], iteration_bounds = array<i64: 1, 1, 1>, scalar_prefetch = 0 : i64, scratch_operands = 1 : i64, tpu.core_type = #tpu.core_type<tc>, window_params = [{transform_indices = @transform_0, window_bounds = array<i64: 128, 256>}, {transform_indices = @transform_1, window_bounds = array<i64: 256, 128>}, {transform_indices = @transform_2, window_bounds = array<i64: 1, 128>}, {transform_indices = @transform_3, window_bounds = array<i64: 1, 128>}, {transform_indices = @transform_4, window_bounds = array<i64: 128, 128>}]} {
    %c0_i32 = arith.constant 0 : i32
    %0 = arith.cmpi eq, %arg2, %c0_i32 : i32
    %1 = arith.extui %0 : i1 to i32
    %c0_i32_0 = arith.constant 0 : i32
    %2 = arith.cmpi ne, %1, %c0_i32_0 : i32
    scf.if %2 {
      %cst_10 = arith.constant 0.000000e+00 : f32
      %12 = vector.broadcast %cst_10 : f32 to vector<128x128xf32>
      %c0_11 = arith.constant 0 : index
      %c0_12 = arith.constant 0 : index
      %13 = vector.load %arg8[%c0_11, %c0_12] : memref<128x128xf32, #tpu.memory_space<vmem>>, vector<128x128xf32>
      tpu.vector_store %arg8[%c0_11, %c0_12], %12 {strides = array<i32>} : memref<128x128xf32, #tpu.memory_space<vmem>>, vector<128x128xf32>,
    } else {
    }
    %c0 = arith.constant 0 : index
    %c0_1 = arith.constant 0 : index
    %3 = vector.load %arg8[%c0, %c0_1] : memref<128x128xf32, #tpu.memory_space<vmem>>, vector<128x128xf32>
    %c0_2 = arith.constant 0 : index
    %c0_3 = arith.constant 0 : index
    %4 = vector.load %arg3[%c0_2, %c0_3] : memref<128x256xbf16, #tpu.memory_space<vmem>>, vector<128x256xbf16>
    %c0_4 = arith.constant 0 : index
    %c0_5 = arith.constant 0 : index
    %5 = vector.load %arg4[%c0_4, %c0_5] : memref<256x128xbf16, #tpu.memory_space<vmem>>, vector<256x128xbf16>
    %cst = arith.constant dense<0.000000e+00> : vector<128x128xf32>
    %6 = tpu.matmul %4, %5, %cst {dimension_numbers = #tpu.dot_dimension_numbers<[1], [0], [0], [1], [0, 0, 1, 1], [], []>} : vector<128x256xbf16>, vector<256x128xbf16>, vector<128x128xf32> -> vector<128x128xf32>
    %7 = arith.addf %3, %6 : vector<128x128xf32>
    %c0_6 = arith.constant 0 : index
    %c0_7 = arith.constant 0 : index
    %8 = vector.load %arg8[%c0_6, %c0_7] : memref<128x128xf32, #tpu.memory_space<vmem>>, vector<128x128xf32>
    tpu.vector_store %arg8[%c0_6, %c0_7], %7 {strides = array<i32>} : memref<128x128xf32, #tpu.memory_space<vmem>>, vector<128x128xf32>,
    %c0_i32_8 = arith.constant 0 : i32
    %9 = arith.cmpi eq, %arg2, %c0_i32_8 : i32
    %10 = arith.extui %9 : i1 to i32
    %c0_i32_9 = arith.constant 0 : i32
    %11 = arith.cmpi ne, %10, %c0_i32_9 : i32
    scf.if %11 {
      %c0_10 = arith.constant 0 : index
      %c0_11 = arith.constant 0 : index
      %12 = vector.load %arg8[%c0_10, %c0_11] : memref<128x128xf32, #tpu.memory_space<vmem>>, vector<128x128xf32>
      %c0_12 = arith.constant 0 : index
      %c0_13 = arith.constant 0 : index
      %13 = vector.load %arg5[%c0_12, %c0_13] : memref<1x128xf32, #tpu.memory_space<vmem>>, vector<1x128xf32>
      %14 = vector.broadcast %13 : vector<1x128xf32> to vector<128x128xf32>
      %15 = arith.mulf %12, %14 : vector<128x128xf32>
      %c0_14 = arith.constant 0 : index
      %c0_15 = arith.constant 0 : index
      %16 = vector.load %arg6[%c0_14, %c0_15] : memref<1x128xf32, #tpu.memory_space<vmem>>, vector<1x128xf32>
      %17 = vector.broadcast %16 : vector<1x128xf32> to vector<128x128xf32>
      %18 = arith.addf %15, %17 : vector<128x128xf32>
      %cst_16 = arith.constant 0.000000e+00 : f32
      %19 = vector.broadcast %cst_16 : f32 to vector<128x128xf32>
      %20 = arith.maximumf %18, %19 : vector<128x128xf32>
      %21 = arith.truncf %20 : vector<128x128xf32> to vector<128x128xbf16>
      %c0_17 = arith.constant 0 : index
      %c0_18 = arith.constant 0 : index
      %22 = vector.load %arg7[%c0_17, %c0_18] : memref<128x128xbf16, #tpu.memory_space<vmem>>, vector<128x128xbf16>
      tpu.vector_store %arg7[%c0_17, %c0_18], %21 {strides = array<i32>} : memref<128x128xbf16, #tpu.memory_space<vmem>>, vector<128x128xbf16>,
    } else {
    }
    return
  }
  func.func @transform_0(%arg0: i32, %arg1: i32, %arg2: i32) -> (i32, i32) {
    %c0_i32 = arith.constant 0 : i32
    return %arg0, %arg2 : i32, i32
  }
  func.func @transform_1(%arg0: i32, %arg1: i32, %arg2: i32) -> (i32, i32) {
    %c0_i32 = arith.constant 0 : i32
    return %arg2, %arg1 : i32, i32
  }
  func.func @transform_2(%arg0: i32, %arg1: i32, %arg2: i32) -> (i32, i32) {
    %c0_i32 = arith.constant 0 : i32
    %c0_i32_0 = arith.constant 0 : i32
    return %c0_i32, %arg1 : i32, i32
  }
  func.func @transform_3(%arg0: i32, %arg1: i32, %arg2: i32) -> (i32, i32) {
    %c0_i32 = arith.constant 0 : i32
    %c0_i32_0 = arith.constant 0 : i32
    return %c0_i32, %arg1 : i32, i32
  }
  func.func @transform_4(%arg0: i32, %arg1: i32, %arg2: i32) -> (i32, i32) {
    %c0_i32 = arith.constant 0 : i32
    return %arg0, %arg1 : i32, i32
  }
}

module attributes {stable_mosaic.version = 11 : i64} {
  func.func @_mm_affine_kernel(%arg0: i32, %arg1: i32, %arg2: i32, %arg3: memref<32x256xbf16, #tpu.memory_space<vmem>>, %arg4: memref<256x128xbf16, #tpu.memory_space<vmem>>, %arg5: memref<1x128xf32, #tpu.memory_space<vmem>>, %arg6: memref<1x128xf32, #tpu.memory_space<vmem>>, %arg7: memref<32x128xbf16, #tpu.memory_space<vmem>>, %arg8: memref<32x128xf32, #tpu.memory_space<vmem>>) attributes {dimension_semantics = [#tpu.dimension_semantics<parallel>, #tpu.dimension_semantics<parallel>, #tpu.dimension_semantics<arbitrary>], iteration_bounds = array<i64: 1, 1, 1>, scalar_prefetch = 0 : i64, scratch_operands = 1 : i64, tpu.core_type = #tpu.core_type<tc>, window_params = [{transform_indices = @transform_0, window_bounds = array<i64: 32, 256>}, {transform_indices = @transform_1, window_bounds = array<i64: 256, 128>}, {transform_indices = @transform_2, window_bounds = array<i64: 1, 128>}, {transform_indices = @transform_3, window_bounds = array<i64: 1, 128>}, {transform_indices = @transform_4, window_bounds = array<i64: 32, 128>}]} {
    %c0_i32 = arith.constant 0 : i32
    %0 = arith.cmpi eq, %arg2, %c0_i32 : i32
    %1 = arith.extui %0 : i1 to i32
    %c0_i32_0 = arith.constant 0 : i32
    %2 = arith.cmpi ne, %1, %c0_i32_0 : i32
    scf.if %2 {
      %cst_10 = arith.constant 0.000000e+00 : f32
      %12 = vector.broadcast %cst_10 : f32 to vector<32x128xf32>
      %c0_11 = arith.constant 0 : index
      %c0_12 = arith.constant 0 : index
      %13 = vector.load %arg8[%c0_11, %c0_12] : memref<32x128xf32, #tpu.memory_space<vmem>>, vector<32x128xf32>
      tpu.vector_store %arg8[%c0_11, %c0_12], %12 {strides = array<i32>} : memref<32x128xf32, #tpu.memory_space<vmem>>, vector<32x128xf32>,
    } else {
    }
    %c0 = arith.constant 0 : index
    %c0_1 = arith.constant 0 : index
    %3 = vector.load %arg8[%c0, %c0_1] : memref<32x128xf32, #tpu.memory_space<vmem>>, vector<32x128xf32>
    %c0_2 = arith.constant 0 : index
    %c0_3 = arith.constant 0 : index
    %4 = vector.load %arg3[%c0_2, %c0_3] : memref<32x256xbf16, #tpu.memory_space<vmem>>, vector<32x256xbf16>
    %c0_4 = arith.constant 0 : index
    %c0_5 = arith.constant 0 : index
    %5 = vector.load %arg4[%c0_4, %c0_5] : memref<256x128xbf16, #tpu.memory_space<vmem>>, vector<256x128xbf16>
    %cst = arith.constant dense<0.000000e+00> : vector<32x128xf32>
    %6 = tpu.matmul %4, %5, %cst {dimension_numbers = #tpu.dot_dimension_numbers<[1], [0], [0], [1], [0, 0, 1, 1], [], []>} : vector<32x256xbf16>, vector<256x128xbf16>, vector<32x128xf32> -> vector<32x128xf32>
    %7 = arith.addf %3, %6 : vector<32x128xf32>
    %c0_6 = arith.constant 0 : index
    %c0_7 = arith.constant 0 : index
    %8 = vector.load %arg8[%c0_6, %c0_7] : memref<32x128xf32, #tpu.memory_space<vmem>>, vector<32x128xf32>
    tpu.vector_store %arg8[%c0_6, %c0_7], %7 {strides = array<i32>} : memref<32x128xf32, #tpu.memory_space<vmem>>, vector<32x128xf32>,
    %c0_i32_8 = arith.constant 0 : i32
    %9 = arith.cmpi eq, %arg2, %c0_i32_8 : i32
    %10 = arith.extui %9 : i1 to i32
    %c0_i32_9 = arith.constant 0 : i32
    %11 = arith.cmpi ne, %10, %c0_i32_9 : i32
    scf.if %11 {
      %c0_10 = arith.constant 0 : index
      %c0_11 = arith.constant 0 : index
      %12 = vector.load %arg8[%c0_10, %c0_11] : memref<32x128xf32, #tpu.memory_space<vmem>>, vector<32x128xf32>
      %c0_12 = arith.constant 0 : index
      %c0_13 = arith.constant 0 : index
      %13 = vector.load %arg5[%c0_12, %c0_13] : memref<1x128xf32, #tpu.memory_space<vmem>>, vector<1x128xf32>
      %14 = vector.broadcast %13 : vector<1x128xf32> to vector<32x128xf32>
      %15 = arith.mulf %12, %14 : vector<32x128xf32>
      %c0_14 = arith.constant 0 : index
      %c0_15 = arith.constant 0 : index
      %16 = vector.load %arg6[%c0_14, %c0_15] : memref<1x128xf32, #tpu.memory_space<vmem>>, vector<1x128xf32>
      %17 = vector.broadcast %16 : vector<1x128xf32> to vector<32x128xf32>
      %18 = arith.addf %15, %17 : vector<32x128xf32>
      %cst_16 = arith.constant 0.000000e+00 : f32
      %19 = vector.broadcast %cst_16 : f32 to vector<32x128xf32>
      %20 = arith.maximumf %18, %19 : vector<32x128xf32>
      %21 = arith.truncf %20 : vector<32x128xf32> to vector<32x128xbf16>
      %c0_17 = arith.constant 0 : index
      %c0_18 = arith.constant 0 : index
      %22 = vector.load %arg7[%c0_17, %c0_18] : memref<32x128xbf16, #tpu.memory_space<vmem>>, vector<32x128xbf16>
      tpu.vector_store %arg7[%c0_17, %c0_18], %21 {strides = array<i32>} : memref<32x128xbf16, #tpu.memory_space<vmem>>, vector<32x128xbf16>,
    } else {
    }
    return
  }
  func.func @transform_0(%arg0: i32, %arg1: i32, %arg2: i32) -> (i32, i32) {
    %c0_i32 = arith.constant 0 : i32
    return %arg0, %arg2 : i32, i32
  }
  func.func @transform_1(%arg0: i32, %arg1: i32, %arg2: i32) -> (i32, i32) {
    %c0_i32 = arith.constant 0 : i32
    return %arg2, %arg1 : i32, i32
  }
  func.func @transform_2(%arg0: i32, %arg1: i32, %arg2: i32) -> (i32, i32) {
    %c0_i32 = arith.constant 0 : i32
    %c0_i32_0 = arith.constant 0 : i32
    return %c0_i32, %arg1 : i32, i32
  }
  func.func @transform_3(%arg0: i32, %arg1: i32, %arg2: i32) -> (i32, i32) {
    %c0_i32 = arith.constant 0 : i32
    %c0_i32_0 = arith.constant 0 : i32
    return %c0_i32, %arg1 : i32, i32
  }
  func.func @transform_4(%arg0: i32, %arg1: i32, %arg2: i32) -> (i32, i32) {
    %c0_i32 = arith.constant 0 : i32
    return %arg0, %arg1 : i32, i32
  }
}

module attributes {stable_mosaic.version = 11 : i64} {
  func.func @_mm_affine_kernel(%arg0: i32, %arg1: i32, %arg2: i32, %arg3: memref<16x384xbf16, #tpu.memory_space<vmem>>, %arg4: memref<384x128xbf16, #tpu.memory_space<vmem>>, %arg5: memref<1x128xf32, #tpu.memory_space<vmem>>, %arg6: memref<1x128xf32, #tpu.memory_space<vmem>>, %arg7: memref<16x128xbf16, #tpu.memory_space<vmem>>, %arg8: memref<16x128xf32, #tpu.memory_space<vmem>>) attributes {dimension_semantics = [#tpu.dimension_semantics<parallel>, #tpu.dimension_semantics<parallel>, #tpu.dimension_semantics<arbitrary>], iteration_bounds = array<i64: 1, 1, 1>, scalar_prefetch = 0 : i64, scratch_operands = 1 : i64, tpu.core_type = #tpu.core_type<tc>, window_params = [{transform_indices = @transform_0, window_bounds = array<i64: 16, 384>}, {transform_indices = @transform_1, window_bounds = array<i64: 384, 128>}, {transform_indices = @transform_2, window_bounds = array<i64: 1, 128>}, {transform_indices = @transform_3, window_bounds = array<i64: 1, 128>}, {transform_indices = @transform_4, window_bounds = array<i64: 16, 128>}]} {
    %c0_i32 = arith.constant 0 : i32
    %0 = arith.cmpi eq, %arg2, %c0_i32 : i32
    %1 = arith.extui %0 : i1 to i32
    %c0_i32_0 = arith.constant 0 : i32
    %2 = arith.cmpi ne, %1, %c0_i32_0 : i32
    scf.if %2 {
      %cst_10 = arith.constant 0.000000e+00 : f32
      %12 = vector.broadcast %cst_10 : f32 to vector<16x128xf32>
      %c0_11 = arith.constant 0 : index
      %c0_12 = arith.constant 0 : index
      %13 = vector.load %arg8[%c0_11, %c0_12] : memref<16x128xf32, #tpu.memory_space<vmem>>, vector<16x128xf32>
      tpu.vector_store %arg8[%c0_11, %c0_12], %12 {strides = array<i32>} : memref<16x128xf32, #tpu.memory_space<vmem>>, vector<16x128xf32>,
    } else {
    }
    %c0 = arith.constant 0 : index
    %c0_1 = arith.constant 0 : index
    %3 = vector.load %arg8[%c0, %c0_1] : memref<16x128xf32, #tpu.memory_space<vmem>>, vector<16x128xf32>
    %c0_2 = arith.constant 0 : index
    %c0_3 = arith.constant 0 : index
    %4 = vector.load %arg3[%c0_2, %c0_3] : memref<16x384xbf16, #tpu.memory_space<vmem>>, vector<16x384xbf16>
    %c0_4 = arith.constant 0 : index
    %c0_5 = arith.constant 0 : index
    %5 = vector.load %arg4[%c0_4, %c0_5] : memref<384x128xbf16, #tpu.memory_space<vmem>>, vector<384x128xbf16>
    %cst = arith.constant dense<0.000000e+00> : vector<16x128xf32>
    %6 = tpu.matmul %4, %5, %cst {dimension_numbers = #tpu.dot_dimension_numbers<[1], [0], [0], [1], [0, 0, 1, 1], [], []>} : vector<16x384xbf16>, vector<384x128xbf16>, vector<16x128xf32> -> vector<16x128xf32>
    %7 = arith.addf %3, %6 : vector<16x128xf32>
    %c0_6 = arith.constant 0 : index
    %c0_7 = arith.constant 0 : index
    %8 = vector.load %arg8[%c0_6, %c0_7] : memref<16x128xf32, #tpu.memory_space<vmem>>, vector<16x128xf32>
    tpu.vector_store %arg8[%c0_6, %c0_7], %7 {strides = array<i32>} : memref<16x128xf32, #tpu.memory_space<vmem>>, vector<16x128xf32>,
    %c0_i32_8 = arith.constant 0 : i32
    %9 = arith.cmpi eq, %arg2, %c0_i32_8 : i32
    %10 = arith.extui %9 : i1 to i32
    %c0_i32_9 = arith.constant 0 : i32
    %11 = arith.cmpi ne, %10, %c0_i32_9 : i32
    scf.if %11 {
      %c0_10 = arith.constant 0 : index
      %c0_11 = arith.constant 0 : index
      %12 = vector.load %arg8[%c0_10, %c0_11] : memref<16x128xf32, #tpu.memory_space<vmem>>, vector<16x128xf32>
      %c0_12 = arith.constant 0 : index
      %c0_13 = arith.constant 0 : index
      %13 = vector.load %arg5[%c0_12, %c0_13] : memref<1x128xf32, #tpu.memory_space<vmem>>, vector<1x128xf32>
      %14 = vector.broadcast %13 : vector<1x128xf32> to vector<16x128xf32>
      %15 = arith.mulf %12, %14 : vector<16x128xf32>
      %c0_14 = arith.constant 0 : index
      %c0_15 = arith.constant 0 : index
      %16 = vector.load %arg6[%c0_14, %c0_15] : memref<1x128xf32, #tpu.memory_space<vmem>>, vector<1x128xf32>
      %17 = vector.broadcast %16 : vector<1x128xf32> to vector<16x128xf32>
      %18 = arith.addf %15, %17 : vector<16x128xf32>
      %cst_16 = arith.constant 0.000000e+00 : f32
      %19 = vector.broadcast %cst_16 : f32 to vector<16x128xf32>
      %20 = arith.maximumf %18, %19 : vector<16x128xf32>
      %21 = arith.truncf %20 : vector<16x128xf32> to vector<16x128xbf16>
      %c0_17 = arith.constant 0 : index
      %c0_18 = arith.constant 0 : index
      %22 = vector.load %arg7[%c0_17, %c0_18] : memref<16x128xbf16, #tpu.memory_space<vmem>>, vector<16x128xbf16>
      tpu.vector_store %arg7[%c0_17, %c0_18], %21 {strides = array<i32>} : memref<16x128xbf16, #tpu.memory_space<vmem>>, vector<16x128xbf16>,
    } else {
    }
    return
  }
  func.func @transform_0(%arg0: i32, %arg1: i32, %arg2: i32) -> (i32, i32) {
    %c0_i32 = arith.constant 0 : i32
    return %arg0, %arg2 : i32, i32
  }
  func.func @transform_1(%arg0: i32, %arg1: i32, %arg2: i32) -> (i32, i32) {
    %c0_i32 = arith.constant 0 : i32
    return %arg2, %arg1 : i32, i32
  }
  func.func @transform_2(%arg0: i32, %arg1: i32, %arg2: i32) -> (i32, i32) {
    %c0_i32 = arith.constant 0 : i32
    %c0_i32_0 = arith.constant 0 : i32
    return %c0_i32, %arg1 : i32, i32
  }
  func.func @transform_3(%arg0: i32, %arg1: i32, %arg2: i32) -> (i32, i32) {
    %c0_i32 = arith.constant 0 : i32
    %c0_i32_0 = arith.constant 0 : i32
    return %c0_i32, %arg1 : i32, i32
  }
  func.func @transform_4(%arg0: i32, %arg1: i32, %arg2: i32) -> (i32, i32) {
    %c0_i32 = arith.constant 0 : i32
    return %arg0, %arg1 : i32, i32
  }
}

module attributes {stable_mosaic.version = 11 : i64} {
  func.func @_mm_affine_kernel(%arg0: i32, %arg1: i32, %arg2: i32, %arg3: memref<16x256xbf16, #tpu.memory_space<vmem>>, %arg4: memref<256x256xbf16, #tpu.memory_space<vmem>>, %arg5: memref<1x256xf32, #tpu.memory_space<vmem>>, %arg6: memref<1x256xf32, #tpu.memory_space<vmem>>, %arg7: memref<16x256xbf16, #tpu.memory_space<vmem>>, %arg8: memref<16x256xf32, #tpu.memory_space<vmem>>) attributes {dimension_semantics = [#tpu.dimension_semantics<parallel>, #tpu.dimension_semantics<parallel>, #tpu.dimension_semantics<arbitrary>], iteration_bounds = array<i64: 1, 2, 1>, scalar_prefetch = 0 : i64, scratch_operands = 1 : i64, tpu.core_type = #tpu.core_type<tc>, window_params = [{transform_indices = @transform_0, window_bounds = array<i64: 16, 256>}, {transform_indices = @transform_1, window_bounds = array<i64: 256, 256>}, {transform_indices = @transform_2, window_bounds = array<i64: 1, 256>}, {transform_indices = @transform_3, window_bounds = array<i64: 1, 256>}, {transform_indices = @transform_4, window_bounds = array<i64: 16, 256>}]} {
    %c0_i32 = arith.constant 0 : i32
    %0 = arith.cmpi eq, %arg2, %c0_i32 : i32
    %1 = arith.extui %0 : i1 to i32
    %c0_i32_0 = arith.constant 0 : i32
    %2 = arith.cmpi ne, %1, %c0_i32_0 : i32
    scf.if %2 {
      %cst_10 = arith.constant 0.000000e+00 : f32
      %12 = vector.broadcast %cst_10 : f32 to vector<16x256xf32>
      %c0_11 = arith.constant 0 : index
      %c0_12 = arith.constant 0 : index
      %13 = vector.load %arg8[%c0_11, %c0_12] : memref<16x256xf32, #tpu.memory_space<vmem>>, vector<16x256xf32>
      tpu.vector_store %arg8[%c0_11, %c0_12], %12 {strides = array<i32>} : memref<16x256xf32, #tpu.memory_space<vmem>>, vector<16x256xf32>,
    } else {
    }
    %c0 = arith.constant 0 : index
    %c0_1 = arith.constant 0 : index
    %3 = vector.load %arg8[%c0, %c0_1] : memref<16x256xf32, #tpu.memory_space<vmem>>, vector<16x256xf32>
    %c0_2 = arith.constant 0 : index
    %c0_3 = arith.constant 0 : index
    %4 = vector.load %arg3[%c0_2, %c0_3] : memref<16x256xbf16, #tpu.memory_space<vmem>>, vector<16x256xbf16>
    %c0_4 = arith.constant 0 : index
    %c0_5 = arith.constant 0 : index
    %5 = vector.load %arg4[%c0_4, %c0_5] : memref<256x256xbf16, #tpu.memory_space<vmem>>, vector<256x256xbf16>
    %cst = arith.constant dense<0.000000e+00> : vector<16x256xf32>
    %6 = tpu.matmul %4, %5, %cst {dimension_numbers = #tpu.dot_dimension_numbers<[1], [0], [0], [1], [0, 0, 1, 1], [], []>} : vector<16x256xbf16>, vector<256x256xbf16>, vector<16x256xf32> -> vector<16x256xf32>
    %7 = arith.addf %3, %6 : vector<16x256xf32>
    %c0_6 = arith.constant 0 : index
    %c0_7 = arith.constant 0 : index
    %8 = vector.load %arg8[%c0_6, %c0_7] : memref<16x256xf32, #tpu.memory_space<vmem>>, vector<16x256xf32>
    tpu.vector_store %arg8[%c0_6, %c0_7], %7 {strides = array<i32>} : memref<16x256xf32, #tpu.memory_space<vmem>>, vector<16x256xf32>,
    %c0_i32_8 = arith.constant 0 : i32
    %9 = arith.cmpi eq, %arg2, %c0_i32_8 : i32
    %10 = arith.extui %9 : i1 to i32
    %c0_i32_9 = arith.constant 0 : i32
    %11 = arith.cmpi ne, %10, %c0_i32_9 : i32
    scf.if %11 {
      %c0_10 = arith.constant 0 : index
      %c0_11 = arith.constant 0 : index
      %12 = vector.load %arg8[%c0_10, %c0_11] : memref<16x256xf32, #tpu.memory_space<vmem>>, vector<16x256xf32>
      %c0_12 = arith.constant 0 : index
      %c0_13 = arith.constant 0 : index
      %13 = vector.load %arg5[%c0_12, %c0_13] : memref<1x256xf32, #tpu.memory_space<vmem>>, vector<1x256xf32>
      %14 = vector.broadcast %13 : vector<1x256xf32> to vector<16x256xf32>
      %15 = arith.mulf %12, %14 : vector<16x256xf32>
      %c0_14 = arith.constant 0 : index
      %c0_15 = arith.constant 0 : index
      %16 = vector.load %arg6[%c0_14, %c0_15] : memref<1x256xf32, #tpu.memory_space<vmem>>, vector<1x256xf32>
      %17 = vector.broadcast %16 : vector<1x256xf32> to vector<16x256xf32>
      %18 = arith.addf %15, %17 : vector<16x256xf32>
      %cst_16 = arith.constant 0.000000e+00 : f32
      %19 = vector.broadcast %cst_16 : f32 to vector<16x256xf32>
      %20 = arith.maximumf %18, %19 : vector<16x256xf32>
      %21 = arith.truncf %20 : vector<16x256xf32> to vector<16x256xbf16>
      %c0_17 = arith.constant 0 : index
      %c0_18 = arith.constant 0 : index
      %22 = vector.load %arg7[%c0_17, %c0_18] : memref<16x256xbf16, #tpu.memory_space<vmem>>, vector<16x256xbf16>
      tpu.vector_store %arg7[%c0_17, %c0_18], %21 {strides = array<i32>} : memref<16x256xbf16, #tpu.memory_space<vmem>>, vector<16x256xbf16>,
    } else {
    }
    return
  }
  func.func @transform_0(%arg0: i32, %arg1: i32, %arg2: i32) -> (i32, i32) {
    %c0_i32 = arith.constant 0 : i32
    return %arg0, %arg2 : i32, i32
  }
  func.func @transform_1(%arg0: i32, %arg1: i32, %arg2: i32) -> (i32, i32) {
    %c0_i32 = arith.constant 0 : i32
    return %arg2, %arg1 : i32, i32
  }
  func.func @transform_2(%arg0: i32, %arg1: i32, %arg2: i32) -> (i32, i32) {
    %c0_i32 = arith.constant 0 : i32
    %c0_i32_0 = arith.constant 0 : i32
    return %c0_i32, %arg1 : i32, i32
  }
  func.func @transform_3(%arg0: i32, %arg1: i32, %arg2: i32) -> (i32, i32) {
    %c0_i32 = arith.constant 0 : i32
    %c0_i32_0 = arith.constant 0 : i32
    return %c0_i32, %arg1 : i32, i32
  }
  func.func @transform_4(%arg0: i32, %arg1: i32, %arg2: i32) -> (i32, i32) {
    %c0_i32 = arith.constant 0 : i32
    return %arg0, %arg1 : i32, i32
  }
}

module attributes {stable_mosaic.version = 11 : i64} {
  func.func @_mm_affine_kernel(%arg0: i32, %arg1: i32, %arg2: i32, %arg3: memref<16x512xbf16, #tpu.memory_space<vmem>>, %arg4: memref<512x128xbf16, #tpu.memory_space<vmem>>, %arg5: memref<1x128xf32, #tpu.memory_space<vmem>>, %arg6: memref<1x128xf32, #tpu.memory_space<vmem>>, %arg7: memref<16x128xf32, #tpu.memory_space<vmem>>, %arg8: memref<16x128xf32, #tpu.memory_space<vmem>>) attributes {dimension_semantics = [#tpu.dimension_semantics<parallel>, #tpu.dimension_semantics<parallel>, #tpu.dimension_semantics<arbitrary>], iteration_bounds = array<i64: 1, 1, 1>, scalar_prefetch = 0 : i64, scratch_operands = 1 : i64, tpu.core_type = #tpu.core_type<tc>, window_params = [{transform_indices = @transform_0, window_bounds = array<i64: 16, 512>}, {transform_indices = @transform_1, window_bounds = array<i64: 512, 128>}, {transform_indices = @transform_2, window_bounds = array<i64: 1, 128>}, {transform_indices = @transform_3, window_bounds = array<i64: 1, 128>}, {transform_indices = @transform_4, window_bounds = array<i64: 16, 128>}]} {
    %c0_i32 = arith.constant 0 : i32
    %0 = arith.cmpi eq, %arg2, %c0_i32 : i32
    %1 = arith.extui %0 : i1 to i32
    %c0_i32_0 = arith.constant 0 : i32
    %2 = arith.cmpi ne, %1, %c0_i32_0 : i32
    scf.if %2 {
      %cst_10 = arith.constant 0.000000e+00 : f32
      %12 = vector.broadcast %cst_10 : f32 to vector<16x128xf32>
      %c0_11 = arith.constant 0 : index
      %c0_12 = arith.constant 0 : index
      %13 = vector.load %arg8[%c0_11, %c0_12] : memref<16x128xf32, #tpu.memory_space<vmem>>, vector<16x128xf32>
      tpu.vector_store %arg8[%c0_11, %c0_12], %12 {strides = array<i32>} : memref<16x128xf32, #tpu.memory_space<vmem>>, vector<16x128xf32>,
    } else {
    }
    %c0 = arith.constant 0 : index
    %c0_1 = arith.constant 0 : index
    %3 = vector.load %arg8[%c0, %c0_1] : memref<16x128xf32, #tpu.memory_space<vmem>>, vector<16x128xf32>
    %c0_2 = arith.constant 0 : index
    %c0_3 = arith.constant 0 : index
    %4 = vector.load %arg3[%c0_2, %c0_3] : memref<16x512xbf16, #tpu.memory_space<vmem>>, vector<16x512xbf16>
    %c0_4 = arith.constant 0 : index
    %c0_5 = arith.constant 0 : index
    %5 = vector.load %arg4[%c0_4, %c0_5] : memref<512x128xbf16, #tpu.memory_space<vmem>>, vector<512x128xbf16>
    %cst = arith.constant dense<0.000000e+00> : vector<16x128xf32>
    %6 = tpu.matmul %4, %5, %cst {dimension_numbers = #tpu.dot_dimension_numbers<[1], [0], [0], [1], [0, 0, 1, 1], [], []>} : vector<16x512xbf16>, vector<512x128xbf16>, vector<16x128xf32> -> vector<16x128xf32>
    %7 = arith.addf %3, %6 : vector<16x128xf32>
    %c0_6 = arith.constant 0 : index
    %c0_7 = arith.constant 0 : index
    %8 = vector.load %arg8[%c0_6, %c0_7] : memref<16x128xf32, #tpu.memory_space<vmem>>, vector<16x128xf32>
    tpu.vector_store %arg8[%c0_6, %c0_7], %7 {strides = array<i32>} : memref<16x128xf32, #tpu.memory_space<vmem>>, vector<16x128xf32>,
    %c0_i32_8 = arith.constant 0 : i32
    %9 = arith.cmpi eq, %arg2, %c0_i32_8 : i32
    %10 = arith.extui %9 : i1 to i32
    %c0_i32_9 = arith.constant 0 : i32
    %11 = arith.cmpi ne, %10, %c0_i32_9 : i32
    scf.if %11 {
      %c0_10 = arith.constant 0 : index
      %c0_11 = arith.constant 0 : index
      %12 = vector.load %arg8[%c0_10, %c0_11] : memref<16x128xf32, #tpu.memory_space<vmem>>, vector<16x128xf32>
      %c0_12 = arith.constant 0 : index
      %c0_13 = arith.constant 0 : index
      %13 = vector.load %arg5[%c0_12, %c0_13] : memref<1x128xf32, #tpu.memory_space<vmem>>, vector<1x128xf32>
      %14 = vector.broadcast %13 : vector<1x128xf32> to vector<16x128xf32>
      %15 = arith.mulf %12, %14 : vector<16x128xf32>
      %c0_14 = arith.constant 0 : index
      %c0_15 = arith.constant 0 : index
      %16 = vector.load %arg6[%c0_14, %c0_15] : memref<1x128xf32, #tpu.memory_space<vmem>>, vector<1x128xf32>
      %17 = vector.broadcast %16 : vector<1x128xf32> to vector<16x128xf32>
      %18 = arith.addf %15, %17 : vector<16x128xf32>
      %c0_16 = arith.constant 0 : index
      %c0_17 = arith.constant 0 : index
      %19 = vector.load %arg7[%c0_16, %c0_17] : memref<16x128xf32, #tpu.memory_space<vmem>>, vector<16x128xf32>
      tpu.vector_store %arg7[%c0_16, %c0_17], %18 {strides = array<i32>} : memref<16x128xf32, #tpu.memory_space<vmem>>, vector<16x128xf32>,
    } else {
    }
    return
  }
  func.func @transform_0(%arg0: i32, %arg1: i32, %arg2: i32) -> (i32, i32) {
    %c0_i32 = arith.constant 0 : i32
    return %arg0, %arg2 : i32, i32
  }
  func.func @transform_1(%arg0: i32, %arg1: i32, %arg2: i32) -> (i32, i32) {
    %c0_i32 = arith.constant 0 : i32
    return %arg2, %arg1 : i32, i32
  }
  func.func @transform_2(%arg0: i32, %arg1: i32, %arg2: i32) -> (i32, i32) {
    %c0_i32 = arith.constant 0 : i32
    %c0_i32_0 = arith.constant 0 : i32
    return %c0_i32, %arg1 : i32, i32
  }
  func.func @transform_3(%arg0: i32, %arg1: i32, %arg2: i32) -> (i32, i32) {
    %c0_i32 = arith.constant 0 : i32
    %c0_i32_0 = arith.constant 0 : i32
    return %c0_i32, %arg1 : i32, i32
  }
  func.func @transform_4(%arg0: i32, %arg1: i32, %arg2: i32) -> (i32, i32) {
    %c0_i32 = arith.constant 0 : i32
    return %arg0, %arg1 : i32, i32
  }
}

</mosaic_0001>

<bundles_post_ra>
// kernel: facecnn_forward.6
= control target key start
LH: loop header
LB: loop body
LE: loop exit
PB: predicated region body
PF: predicated region fallthrough
CT: control target
= control target key end

     0   :  { %s1598_s15 = smov 0   ;;  %s1600_s16 = smov 0   ;;  %s1772_s0 = inlined_call_operand.vmem [shape: bf16[512,128], index: 0, kind: input, shape index: {}]   ;;  %s1773_s1 = inlined_call_operand.vmem [shape: bf16[128,128], index: 1, kind: input, shape index: {}]   ;;  %s1774_s2 = inlined_call_operand.vmem [shape: f32[1,128], index: 2, kind: input, shape index: {}]   ;;  %s1775_s3 = inlined_call_operand.vmem [shape: f32[1,128], index: 3, kind: input, shape index: {}]   ;;  %s1776_s4 = inlined_call_operand.vmem [shape: bf16[512,128], index: 4, kind: output, shape index: {}]  }
   0x1   :  { %s1602_s17 = smov 0  }
   0x2 LB: > { %s33_s18 = sadd.s32 1, %s1567_s16  ;;  %p1221_p0 = scmp.ge.s32.totalorder %s1571_s17, 1  ;;  %s1571_s17 = sphi %s1602_s17, %s14_s17   ;;  %s1567_s16 = sphi %s1600_s16, %s1778_s16   ;;  %s1563_s15 = sphi %s1598_s15, %s1777_s15  }
   0x3   : > { %p35_p1 = scmp.ge.s32.totalorder %s33_s18, 2  ;;  %p221_p2 = scmp.lt.s32.totalorder %s1571_s17, 3 }
   0x5   : > { %s1780_s18 = smov (%p35_p1, %s33_s18), 0  ;;  %p222_p3 = pnand %p1221_p0, %p221_p2 }
   0x6   : > { %s1222_s21 = sshll.u32 (!%p222_p3), %s1563_s15, 5 }
   0x7   : > { %225 = sbr.rel (%p222_p3) target bundleno = 277 (0x115), region = 36  ;;  %p268_p4 = scmp.lt.s32.totalorder (!%p222_p3), %s1222_s21, 63 }
   0xc   : > { %v1525_v0 = vld [vmem:[%s1773_s1 + $0x38] sm:$0xff]   ;;  %v1526_v1 = vld [vmem:[%s1773_s1 + $0x30] sm:$0xff]   ;;  %s1782_s21 = smov (!%p268_p4, %s1222_s21), 63  ;;  %v1527_v2 = vld [vmem:[%s1773_s1 + $0x28] sm:$0xff]  }
   0xd   : > { %1437 = vmatprep.subr.bf16.mxu0 %v1525_v0  ;;  %1485 = vmatprep.subr.bf16.mxu1 %v1525_v0  ;;  %s1223_s26 = sshll.u32 %s1782_s21, 2  ;;  %v1528_v3 = vld [vmem:[%s1773_s1 + $0x20] sm:$0xff]   ;;  %v1529_v6 = vld [vmem:[%s1773_s1 + $0x18] sm:$0xff]   ;;  %v1530_v7 = vld [vmem:[%s1773_s1 + $0x10] sm:$0xff]  }
   0xe   : > { %1438 = vmatpush3.bf16.msra.mxu0 %v1525_v0  ;;  %1493 = vmatpush3.bf16.msra.mxu1 %v1525_v0  ;;  %s1633_s29 = scalar_lea.vmem %s1772_s0, %s1223_s26  ;;  %v1531_v8 = vld [vmem:[%s1773_s1 + $0x8] sm:$0xff]   ;;  %v1532_v9 = vld [vmem:[%s1773_s1] sm:$0xff]   ;;  %s1699_s24 = scalar_lea.vmem %s1776_s4, %s1223_s26 }
   0xf   : > { %1439 = vmatprep.subr.bf16.mxu0 %v1526_v1  ;;  %1486 = vmatprep.subr.bf16.mxu1 %v1526_v1  ;;  %v1533_v4 = vld [vmem:[%s1633_s29] sm:$0xff]   ;;  %v1535_v10 = vld [vmem:[%s1633_s29 + $0x8] sm:$0xff]   ;;  %v1537_v12 = vld [vmem:[%s1633_s29 + $0x10] sm:$0xff]  }
  0x10   : > { %v1534_v5 = vld [vmem:[%s1633_s29 + $0x40] sm:$0xff]   ;;  %1453 = vmatprep.mubr.bf16.mxu0 %v1533_v4  ;;  %v1536_v11 = vld [vmem:[%s1633_s29 + $0x48] sm:$0xff]   ;;  %v1538_v13 = vld [vmem:[%s1633_s29 + $0x50] sm:$0xff]  }
  0x11   : > { %1469 = vmatprep.mubr.bf16.mxu1 %v1534_v5  ;;  %v1539_v14 = vld [vmem:[%s1633_s29 + $0x18] sm:$0xff]   ;;  %v1541_v16 = vld [vmem:[%s1633_s29 + $0x20] sm:$0xff]   ;;  %v1543_v18 = vld [vmem:[%s1633_s29 + $0x28] sm:$0xff]  }
  0x12   : > { %1440 = vmatpush3.bf16.msra.mxu0 %v1526_v1  ;;  %1494 = vmatpush3.bf16.msra.mxu1 %v1526_v1  ;;  %v1540_v15 = vld [vmem:[%s1633_s29 + $0x58] sm:$0xff]   ;;  %v1542_v17 = vld [vmem:[%s1633_s29 + $0x60] sm:$0xff]   ;;  %v1544_v19 = vld [vmem:[%s1633_s29 + $0x68] sm:$0xff]  }
  0x13   : > { %1441 = vmatprep.subr.bf16.mxu0 %v1527_v2  ;;  %1487 = vmatprep.subr.bf16.mxu1 %v1527_v2  ;;  %v1545_v20 = vld [vmem:[%s1633_s29 + $0x30] sm:$0xff]   ;;  %v1547_v22 = vld [vmem:[%s1633_s29 + $0x38] sm:$0xff]   ;;  %v1669_v24 = vld [vmem:[%s1774_s2] ss:$0 sm:$0xff] }
  0x14   : > { %v1546_v21 = vld [vmem:[%s1633_s29 + $0x70] sm:$0xff]   ;;  %v1548_v23 = vld [vmem:[%s1633_s29 + $0x78] sm:$0xff]   ;;  %v1676_v29 = vld [vmem:[%s1775_s3] ss:$0 sm:$0xff] }
  0x16   : > { %1442 = vmatpush3.bf16.msra.mxu0 %v1527_v2  ;;  %1495 = vmatpush3.bf16.msra.mxu1 %v1527_v2 }
  0x17   : > { %1443 = vmatprep.subr.bf16.mxu0 %v1528_v3  ;;  %1488 = vmatprep.subr.bf16.mxu1 %v1528_v3 }
  0x1a   : > { %1444 = vmatpush3.bf16.msra.mxu0 %v1528_v3  ;;  %1496 = vmatpush3.bf16.msra.mxu1 %v1528_v3 }
  0x1b   : > { %1445 = vmatprep.subr.bf16.mxu0 %v1529_v6  ;;  %1489 = vmatprep.subr.bf16.mxu1 %v1529_v6 }
  0x1e   : > { %1446 = vmatpush3.bf16.msra.mxu0 %v1529_v6  ;;  %1497 = vmatpush3.bf16.msra.mxu1 %v1529_v6 }
  0x1f   : > { %1447 = vmatprep.subr.bf16.mxu0 %v1530_v7  ;;  %1490 = vmatprep.subr.bf16.mxu1 %v1530_v7 }
  0x22   : > { %1448 = vmatpush3.bf16.msra.mxu0 %v1530_v7  ;;  %1498 = vmatpush3.bf16.msra.mxu1 %v1530_v7 }
  0x23   : > { %1449 = vmatprep.subr.bf16.mxu0 %v1531_v8  ;;  %1491 = vmatprep.subr.bf16.mxu1 %v1531_v8 }
  0x26   : > { %1450 = vmatpush3.bf16.msra.mxu0 %v1531_v8  ;;  %1499 = vmatpush3.bf16.msra.mxu1 %v1531_v8 }
  0x27   : > { %1451 = vmatprep.subr.bf16.mxu0 %v1532_v9  ;;  %1492 = vmatprep.subr.bf16.mxu1 %v1532_v9 }
  0x2a   : > { %1452 = vmatpush3.bf16.msra.mxu0 %v1532_v9  ;;  %1500 = vmatpush3.bf16.msra.mxu1 %v1532_v9 }
  0x2d   : > { %1454 = vmatmul.mubr.bf16.vlgmr.msra.gmra.mxu0 %v1535_v10  ;;  %1470 = vmatmul.mubr.bf16.vlgmr.msra.gmra.mxu1 %v1536_v11 }
  0x2e   : > { %1457 = vmatprep.mubr.bf16.mxu0 %v1537_v12  ;;  %1473 = vmatprep.mubr.bf16.mxu1 %v1538_v13 }
  0x35   : > { %1458 = vmatmul.mubr.bf16.gmra.mxu0 %v1539_v14  ;;  %1474 = vmatmul.mubr.bf16.gmra.mxu1 %v1540_v15 }
  0x36   : > { %1461 = vmatprep.mubr.bf16.mxu0 %v1541_v16  ;;  %1477 = vmatprep.mubr.bf16.mxu1 %v1542_v17 }
  0x3d   : > { %1462 = vmatmul.mubr.bf16.gmra.mxu0 %v1543_v18  ;;  %1478 = vmatmul.mubr.bf16.gmra.mxu1 %v1544_v19 }
  0x3e   : > { %1465 = vmatprep.mubr.bf16.mxu0 %v1545_v20  ;;  %1481 = vmatprep.mubr.bf16.mxu1 %v1546_v21 }
  0x45   : > { %1466 = vmatmul.mubr.bf16.gmra.mxu0 %v1547_v22  ;;  %1482 = vmatmul.mubr.bf16.gmra.mxu1 %v1548_v23 }
  0xed   : > { %v1455_v25 = vpop.f32.mrf.mxu0  ;;  %v1471_v26 = vpop.f32.mrf.mxu1 }
  0xee   : > { %v830_v27 = vmul.f32 %v1455_v25, %v1669_v24  ;;  %v846_v28 = vmul.f32 %v1471_v26, %v1669_v24 }
  0xef   : > { %v595_v30 = vpop.f32.mrf.mxu0  ;;  %v659_v31 = vpop.f32.mrf.mxu1 }
  0xf0   : > { %v828_v32 = vmul.f32 %v1669_v24, %v595_v30  ;;  %v844_v33 = vmul.f32 %v1669_v24, %v659_v31  ;;  %v869_v36 = vadd.f32 %v1676_v29, %v830_v27  ;;  %v885_v37 = vadd.f32 %v1676_v29, %v846_v28 }
  0xf1   : > { %v1456_v34 = vpop.f32.mrf.mxu0  ;;  %v1472_v35 = vpop.f32.mrf.mxu1 }
  0xf2   : > { %v831_v38 = vmul.f32 %v1456_v34, %v1669_v24  ;;  %v847_v39 = vmul.f32 %v1472_v35, %v1669_v24  ;;  %v867_v42 = vadd.f32 %v1676_v29, %v828_v32  ;;  %v883_v43 = vadd.f32 %v1676_v29, %v844_v33 }
  0xf3   : > { %v598_v40 = vpop.f32.mrf.mxu0  ;;  %v662_v41 = vpop.f32.mrf.mxu1  ;;  %v901_v50 = vmax.f32 %v869_v36, 0.0  ;;  %v917_v51 = vmax.f32 %v885_v37, 0.0 }
  0xf4   : > { %v829_v44 = vmul.f32 %v1669_v24, %v598_v40  ;;  %v845_v45 = vmul.f32 %v1669_v24, %v662_v41  ;;  %v870_v46 = vadd.f32 %v1676_v29, %v831_v38  ;;  %v886_v47 = vadd.f32 %v1676_v29, %v847_v39 }
  0xf5   : > { %v1459_v48 = vpop.f32.mrf.mxu0  ;;  %v1475_v49 = vpop.f32.mrf.mxu1  ;;  %v899_v60 = vmax.f32 %v867_v42, 0.0  ;;  %v915_v61 = vmax.f32 %v883_v43, 0.0 }
  0xf6   : > { %v868_v52 = vadd.f32 %v1676_v29, %v829_v44  ;;  %v884_v53 = vadd.f32 %v1676_v29, %v845_v45  ;;  %v902_v54 = vmax.f32 %v870_v46, 0.0  ;;  %v918_v55 = vmax.f32 %v886_v47, 0.0 }
  0xf7   : > { %v834_v56 = vmul.f32 %v1459_v48, %v1669_v24  ;;  %v850_v57 = vmul.f32 %v1475_v49, %v1669_v24  ;;  %v611_v58 = vpop.f32.mrf.mxu0  ;;  %v675_v59 = vpop.f32.mrf.mxu1 }
  0xf8   : > { %v900_v62 = vmax.f32 %v868_v52, 0.0  ;;  %v916_v63 = vmax.f32 %v884_v53, 0.0  ;;  %v1326_v0 = vpack.c.bf16 %v902_v54, %v901_v50  ;;  %v1366_v1 = vpack.c.bf16 %v918_v55, %v917_v51 }
  0xf9   : > { %v832_v2 = vmul.f32 %v1669_v24, %v611_v58  ;;  %v848_v3 = vmul.f32 %v1669_v24, %v675_v59  ;;  %v1460_v4 = vpop.f32.mrf.mxu0  ;;  %v1476_v5 = vpop.f32.mrf.mxu1  ;;  %v873_v8 = vadd.f32 %v1676_v29, %v834_v56  ;;  %v889_v9 = vadd.f32 %v1676_v29, %v850_v57 }
  0xfa   : > { %v1321_v6 = vpack.c.bf16 %v900_v62, %v899_v60  ;;  %v1361_v7 = vpack.c.bf16 %v916_v63, %v915_v61  ;;  %1398 = vst [vmem:[%s1699_s24 + $0x8] sm:$0xff] %v1326_v0   ;;  %1406 = vst [vmem:[%s1699_s24 + $0x48] sm:$0xff] %v1366_v1   ;;  %v835_v10 = vmul.f32 %v1460_v4, %v1669_v24 }
  0xfb   : > { %v851_v11 = vmul.f32 %v1476_v5, %v1669_v24  ;;  %v614_v12 = vpop.f32.mrf.mxu0  ;;  %v678_v13 = vpop.f32.mrf.mxu1  ;;  %v871_v14 = vadd.f32 %v1676_v29, %v832_v2  ;;  %v887_v15 = vadd.f32 %v1676_v29, %v848_v3  ;;  %v905_v27 = vmax.f32 %v873_v8, 0.0 }
  0xfc   : > { %1322 = vst [vmem:[%s1699_s24] sm:$0xff] %v1321_v6   ;;  %1405 = vst [vmem:[%s1699_s24 + $0x40] sm:$0xff] %v1361_v7   ;;  %v833_v16 = vmul.f32 %v1669_v24, %v614_v12  ;;  %v849_v17 = vmul.f32 %v1669_v24, %v678_v13  ;;  %v874_v18 = vadd.f32 %v1676_v29, %v835_v10  ;;  %v921_v28 = vmax.f32 %v889_v9, 0.0 }
  0xfd   : > { %v890_v19 = vadd.f32 %v1676_v29, %v851_v11  ;;  %v1463_v20 = vpop.f32.mrf.mxu0  ;;  %v1479_v21 = vpop.f32.mrf.mxu1  ;;  %v903_v34 = vmax.f32 %v871_v14, 0.0  ;;  %v919_v35 = vmax.f32 %v887_v15, 0.0 }
  0xfe   : > { %v872_v22 = vadd.f32 %v1676_v29, %v833_v16  ;;  %v888_v23 = vadd.f32 %v1676_v29, %v849_v17  ;;  %v838_v25 = vmul.f32 %v1463_v20, %v1669_v24  ;;  %v854_v26 = vmul.f32 %v1479_v21, %v1669_v24 }
  0xff   : > { %v906_v30 = vmax.f32 %v874_v18, 0.0  ;;  %v922_v31 = vmax.f32 %v890_v19, 0.0  ;;  %v627_v32 = vpop.f32.mrf.mxu0  ;;  %v691_v33 = vpop.f32.mrf.mxu1 }
 0x100   : > { %v904_v36 = vmax.f32 %v872_v22, 0.0  ;;  %v920_v37 = vmax.f32 %v888_v23, 0.0  ;;  %v836_v40 = vmul.f32 %v1669_v24, %v627_v32  ;;  %v852_v41 = vmul.f32 %v1669_v24, %v691_v33 }
 0x101   : > { %v1336_v38 = vpack.c.bf16 %v906_v30, %v905_v27  ;;  %v1376_v39 = vpack.c.bf16 %v922_v31, %v921_v28  ;;  %v1464_v42 = vpop.f32.mrf.mxu0  ;;  %v1480_v43 = vpop.f32.mrf.mxu1  ;;  %v877_v46 = vadd.f32 %v1676_v29, %v838_v25  ;;  %v893_v47 = vadd.f32 %v1676_v29, %v854_v26 }
 0x102   : > { %v1331_v44 = vpack.c.bf16 %v904_v36, %v903_v34  ;;  %v1371_v45 = vpack.c.bf16 %v920_v37, %v919_v35  ;;  %v839_v48 = vmul.f32 %v1464_v42, %v1669_v24  ;;  %v855_v49 = vmul.f32 %v1480_v43, %v1669_v24 }
 0x103   : > { %1400 = vst [vmem:[%s1699_s24 + $0x18] sm:$0xff] %v1336_v38   ;;  %1408 = vst [vmem:[%s1699_s24 + $0x58] sm:$0xff] %v1376_v39   ;;  %v630_v50 = vpop.f32.mrf.mxu0  ;;  %v694_v51 = vpop.f32.mrf.mxu1  ;;  %v875_v52 = vadd.f32 %v1676_v29, %v836_v40  ;;  %v891_v53 = vadd.f32 %v1676_v29, %v852_v41  ;;  %v909_v60 = vmax.f32 %v877_v46, 0.0  ;;  %v925_v61 = vmax.f32 %v893_v47, 0.0 }
 0x104   : > { %1399 = vst [vmem:[%s1699_s24 + $0x10] sm:$0xff] %v1331_v44   ;;  %1407 = vst [vmem:[%s1699_s24 + $0x50] sm:$0xff] %v1371_v45   ;;  %v837_v54 = vmul.f32 %v1669_v24, %v630_v50  ;;  %v853_v55 = vmul.f32 %v1669_v24, %v694_v51  ;;  %v878_v56 = vadd.f32 %v1676_v29, %v839_v48 }
 0x105   : > { %v894_v57 = vadd.f32 %v1676_v29, %v855_v49  ;;  %v1467_v58 = vpop.f32.mrf.mxu0  ;;  %v1483_v59 = vpop.f32.mrf.mxu1  ;;  %v907_v6 = vmax.f32 %v875_v52, 0.0  ;;  %v923_v7 = vmax.f32 %v891_v53, 0.0 }
 0x106   : > { %v876_v62 = vadd.f32 %v1676_v29, %v837_v54  ;;  %v892_v63 = vadd.f32 %v1676_v29, %v853_v55  ;;  %v910_v0 = vmax.f32 %v878_v56, 0.0  ;;  %v842_v2 = vmul.f32 %v1467_v58, %v1669_v24 }
 0x107   : > { %v926_v1 = vmax.f32 %v894_v57, 0.0  ;;  %v858_v3 = vmul.f32 %v1483_v59, %v1669_v24  ;;  %v643_v4 = vpop.f32.mrf.mxu0  ;;  %v707_v5 = vpop.f32.mrf.mxu1 }
 0x108   : > { %v908_v8 = vmax.f32 %v876_v62, 0.0  ;;  %v924_v9 = vmax.f32 %v892_v63, 0.0  ;;  %v1346_v10 = vpack.c.bf16 %v910_v0, %v909_v60  ;;  %v840_v12 = vmul.f32 %v1669_v24, %v643_v4 }
 0x109   : > { %v1386_v11 = vpack.c.bf16 %v926_v1, %v925_v61  ;;  %v856_v13 = vmul.f32 %v1669_v24, %v707_v5  ;;  %v1468_v14 = vpop.f32.mrf.mxu0  ;;  %v1484_v15 = vpop.f32.mrf.mxu1  ;;  %v881_v18 = vadd.f32 %v1676_v29, %v842_v2  ;;  %v897_v19 = vadd.f32 %v1676_v29, %v858_v3 }
 0x10a   : > { %v1341_v16 = vpack.c.bf16 %v908_v8, %v907_v6  ;;  %v1381_v17 = vpack.c.bf16 %v924_v9, %v923_v7  ;;  %1402 = vst [vmem:[%s1699_s24 + $0x28] sm:$0xff] %v1346_v10   ;;  %v843_v20 = vmul.f32 %v1468_v14, %v1669_v24  ;;  %v859_v21 = vmul.f32 %v1484_v15, %v1669_v24 }
 0x10b   : > { %1410 = vst [vmem:[%s1699_s24 + $0x68] sm:$0xff] %v1386_v11   ;;  %v646_v22 = vpop.f32.mrf.mxu0  ;;  %v710_v23 = vpop.f32.mrf.mxu1  ;;  %v879_v25 = vadd.f32 %v1676_v29, %v840_v12  ;;  %v895_v26 = vadd.f32 %v1676_v29, %v856_v13  ;;  %v913_v34 = vmax.f32 %v881_v18, 0.0  ;;  %v929_v35 = vmax.f32 %v897_v19, 0.0 }
 0x10c   : > { %1401 = vst [vmem:[%s1699_s24 + $0x20] sm:$0xff] %v1341_v16   ;;  %1409 = vst [vmem:[%s1699_s24 + $0x60] sm:$0xff] %v1381_v17   ;;  %v841_v27 = vmul.f32 %v1669_v24, %v646_v22  ;;  %v857_v28 = vmul.f32 %v1669_v24, %v710_v23  ;;  %v882_v30 = vadd.f32 %v1676_v29, %v843_v20 }
 0x10d   : > { %v898_v31 = vadd.f32 %v1676_v29, %v859_v21  ;;  %v911_v38 = vmax.f32 %v879_v25, 0.0  ;;  %v927_v39 = vmax.f32 %v895_v26, 0.0 }
 0x10e   : > { %v880_v32 = vadd.f32 %v1676_v29, %v841_v27  ;;  %v896_v33 = vadd.f32 %v1676_v29, %v857_v28  ;;  %v914_v36 = vmax.f32 %v882_v30, 0.0 }
 0x10f   : > { %v930_v37 = vmax.f32 %v898_v31, 0.0 }
 0x110   : > { %v912_v40 = vmax.f32 %v880_v32, 0.0  ;;  %v928_v24 = vmax.f32 %v896_v33, 0.0  ;;  %v1356_v41 = vpack.c.bf16 %v914_v36, %v913_v34 }
 0x111   : > { %v1396_v42 = vpack.c.bf16 %v930_v37, %v929_v35 }
 0x112   : > { %v1351_v43 = vpack.c.bf16 %v912_v40, %v911_v38  ;;  %v1391_v44 = vpack.c.bf16 %v928_v24, %v927_v39  ;;  %1404 = vst [vmem:[%s1699_s24 + $0x38] sm:$0xff] %v1356_v41  }
 0x113   : > { %1412 = vst [vmem:[%s1699_s24 + $0x78] sm:$0xff] %v1396_v42  }
 0x114   : > { %1403 = vst [vmem:[%s1699_s24 + $0x30] sm:$0xff] %v1351_v43   ;;  %1411 = vst [vmem:[%s1699_s24 + $0x70] sm:$0xff] %v1391_v44  }
 0x115 PF: > { %s14_s17 = sadd.s32 1, %s1571_s17   ;;  %s1777_s15 = smov %s1567_s16 }
 0x116   : > { %p11_p5 = scmp.ge.s32.totalorder %s14_s17, 4   ;;  %s1778_s16 = smov %s1780_s18 }
 0x118   :  { %13 = sbr.rel (!%p11_p5) target bundleno = 2 (0x2), region = 83 }

// kernel: facecnn_forward.7
= control target key start
LH: loop header
LB: loop body
LE: loop exit
PB: predicated region body
PF: predicated region fallthrough
CT: control target
= control target key end

     0   :  { %s992_s1 = inlined_call_operand.vmem [shape: bf16[256,128], index: 1, kind: input, shape index: {}]   ;;  %s993_s0 = inlined_call_operand.vmem [shape: bf16[128,256], index: 0, kind: input, shape index: {}]   ;;  %s994_s2 = inlined_call_operand.vmem [shape: f32[1,128], index: 2, kind: input, shape index: {}]   ;;  %s995_s3 = inlined_call_operand.vmem [shape: f32[1,128], index: 3, kind: input, shape index: {}]   ;;  %s996_s4 = inlined_call_operand.vmem [shape: bf16[128,128], index: 4, kind: output, shape index: {}]  }
   0x1   :  { %v765_v0 = vld [vmem:[%s992_s1 + $0x78] sm:$0xff]   ;;  %v767_v2 = vld [vmem:[%s992_s1 + $0x70] sm:$0xff]   ;;  %v769_v4 = vld [vmem:[%s992_s1 + $0x68] sm:$0xff]  }
   0x2   :  { %v766_v1 = vld [vmem:[%s992_s1 + $0x38] sm:$0xff]   ;;  %685 = vmatprep.subr.bf16.mxu0 %v765_v0  ;;  %749 = vmatprep.subr.bf16.mxu1 %v765_v0  ;;  %v768_v3 = vld [vmem:[%s992_s1 + $0x30] sm:$0xff]   ;;  %v770_v5 = vld [vmem:[%s992_s1 + $0x28] sm:$0xff]  }
   0x3   :  { %686 = vmatpush3.bf16.msra.mxu0 %v766_v1  ;;  %757 = vmatpush3.bf16.msra.mxu1 %v766_v1  ;;  %v771_v6 = vld [vmem:[%s992_s1 + $0x60] sm:$0xff]   ;;  %v773_v8 = vld [vmem:[%s992_s1 + $0x58] sm:$0xff]   ;;  %v775_v10 = vld [vmem:[%s992_s1 + $0x50] sm:$0xff]  }
   0x4   :  { %687 = vmatprep.subr.bf16.mxu0 %v767_v2  ;;  %750 = vmatprep.subr.bf16.mxu1 %v767_v2  ;;  %v772_v7 = vld [vmem:[%s992_s1 + $0x20] sm:$0xff]   ;;  %v774_v9 = vld [vmem:[%s992_s1 + $0x18] sm:$0xff]   ;;  %v776_v13 = vld [vmem:[%s992_s1 + $0x10] sm:$0xff]  }
   0x5   :  { %v783_v11 = vld [vmem:[%s993_s0 + $0x4] ss:$8 sps:$4 sm:$0xff]   ;;  %v781_v18 = vld [vmem:[%s993_s0] ss:$8 sps:$4 sm:$0xff]   ;;  %v787_v20 = vld [vmem:[%s993_s0 + $0x14] ss:$8 sps:$4 sm:$0xff]  }
   0x6   :  { %v786_v12 = vld [vmem:[%s993_s0 + $0x44] ss:$8 sps:$4 sm:$0xff]   ;;  %310 = vmatprep.mubr.bf16.mxu0 %v783_v11  ;;  %v784_v19 = vld [vmem:[%s993_s0 + $0x40] ss:$8 sps:$4 sm:$0xff]   ;;  %v789_v21 = vld [vmem:[%s993_s0 + $0x54] ss:$8 sps:$4 sm:$0xff]  }
   0x7   :  { %688 = vmatpush3.bf16.msra.mxu0 %v768_v3  ;;  %758 = vmatpush3.bf16.msra.mxu1 %v768_v3  ;;  %v777_v14 = vld [vmem:[%s992_s1 + $0x48] sm:$0xff]   ;;  %v779_v16 = vld [vmem:[%s992_s1 + $0x40] sm:$0xff]   ;;  %v791_v22 = vld [vmem:[%s993_s0 + $0x10] ss:$8 sps:$4 sm:$0xff]  }
   0x8   :  { %689 = vmatprep.subr.bf16.mxu0 %v769_v4  ;;  %751 = vmatprep.subr.bf16.mxu1 %v769_v4  ;;  %v778_v15 = vld [vmem:[%s992_s1 + $0x8] sm:$0xff]   ;;  %v780_v17 = vld [vmem:[%s992_s1] sm:$0xff]   ;;  %v792_v23 = vld [vmem:[%s993_s0 + $0x50] ss:$8 sps:$4 sm:$0xff]  }
   0x9   :  { %342 = vmatprep.mubr.bf16.mxu1 %v786_v12  ;;  %v793_v24 = vld [vmem:[%s993_s0 + $0x24] ss:$8 sps:$4 sm:$0xff]   ;;  %v797_v26 = vld [vmem:[%s993_s0 + $0x20] ss:$8 sps:$4 sm:$0xff]   ;;  %v799_v28 = vld [vmem:[%s993_s0 + $0x34] ss:$8 sps:$4 sm:$0xff]  }
   0xa   :  { %v795_v25 = vld [vmem:[%s993_s0 + $0x64] ss:$8 sps:$4 sm:$0xff]   ;;  %v798_v27 = vld [vmem:[%s993_s0 + $0x60] ss:$8 sps:$4 sm:$0xff]   ;;  %v801_v29 = vld [vmem:[%s993_s0 + $0x74] ss:$8 sps:$4 sm:$0xff]  }
   0xb   :  { %690 = vmatpush3.bf16.msra.mxu0 %v770_v5  ;;  %759 = vmatpush3.bf16.msra.mxu1 %v770_v5  ;;  %v803_v30 = vld [vmem:[%s993_s0 + $0x30] ss:$8 sps:$4 sm:$0xff]   ;;  %v929_v35 = vld [vmem:[%s994_s2] ss:$0 sm:$0xff] }
   0xc   :  { %691 = vmatprep.subr.bf16.mxu0 %v771_v6  ;;  %752 = vmatprep.subr.bf16.mxu1 %v771_v6  ;;  %v804_v31 = vld [vmem:[%s993_s0 + $0x70] ss:$8 sps:$4 sm:$0xff]   ;;  %v936_v43 = vld [vmem:[%s995_s3] ss:$0 sm:$0xff] }
   0xf   :  { %692 = vmatpush3.bf16.msra.mxu0 %v772_v7  ;;  %760 = vmatpush3.bf16.msra.mxu1 %v772_v7 }
  0x10   :  { %693 = vmatprep.subr.bf16.mxu0 %v773_v8  ;;  %753 = vmatprep.subr.bf16.mxu1 %v773_v8 }
  0x13   :  { %694 = vmatpush3.bf16.msra.mxu0 %v774_v9  ;;  %761 = vmatpush3.bf16.msra.mxu1 %v774_v9 }
  0x14   :  { %695 = vmatprep.subr.bf16.mxu0 %v775_v10  ;;  %754 = vmatprep.subr.bf16.mxu1 %v775_v10 }
  0x17   :  { %696 = vmatpush3.bf16.msra.mxu0 %v776_v13  ;;  %762 = vmatpush3.bf16.msra.mxu1 %v776_v13 }
  0x18   :  { %697 = vmatprep.subr.bf16.mxu0 %v777_v14  ;;  %755 = vmatprep.subr.bf16.mxu1 %v777_v14 }
  0x1b   :  { %698 = vmatpush3.bf16.msra.mxu0 %v778_v15  ;;  %763 = vmatpush3.bf16.msra.mxu1 %v778_v15 }
  0x1c   :  { %699 = vmatprep.subr.bf16.mxu0 %v779_v16  ;;  %756 = vmatprep.subr.bf16.mxu1 %v779_v16 }
  0x1f   :  { %700 = vmatpush3.bf16.msra.mxu0 %v780_v17  ;;  %764 = vmatpush3.bf16.msra.mxu1 %v780_v17 }
  0x22   :  { %311 = vmatmul.mubr.bf16.vlgmr.msra.gmra.mxu0 %v781_v18  ;;  %343 = vmatmul.mubr.bf16.vlgmr.msra.gmra.mxu1 %v784_v19 }
  0x23   :  { %318 = vmatprep.mubr.bf16.mxu0 %v787_v20  ;;  %350 = vmatprep.mubr.bf16.mxu1 %v789_v21 }
  0x2a   :  { %319 = vmatmul.mubr.bf16.gmra.mxu0 %v791_v22  ;;  %351 = vmatmul.mubr.bf16.gmra.mxu1 %v792_v23 }
  0x2b   :  { %326 = vmatprep.mubr.bf16.mxu0 %v793_v24  ;;  %358 = vmatprep.mubr.bf16.mxu1 %v795_v25 }
  0x32   :  { %327 = vmatmul.mubr.bf16.gmra.mxu0 %v797_v26  ;;  %359 = vmatmul.mubr.bf16.gmra.mxu1 %v798_v27 }
  0x33   :  { %334 = vmatprep.mubr.bf16.mxu0 %v799_v28  ;;  %366 = vmatprep.mubr.bf16.mxu1 %v801_v29 }
  0x3a   :  { %335 = vmatmul.mubr.bf16.gmra.mxu0 %v803_v30  ;;  %367 = vmatmul.mubr.bf16.gmra.mxu1 %v804_v31 }
  0xe2   :  { %v701_v32 = vpop.f32.mrf.mxu0  ;;  %v725_v33 = vpop.f32.mrf.mxu1 }
  0xe4   :  { %v702_v34 = vpop.f32.mrf.mxu0  ;;  %v726_v36 = vpop.f32.mrf.mxu1 }
  0xe5   :  { %v703_v37 = vadd.f32 %v702_v34, %v701_v32  ;;  %v727_v38 = vadd.f32 %v726_v36, %v725_v33 }
  0xe6   :  { %v704_v39 = vpop.f32.mrf.mxu0  ;;  %v728_v40 = vpop.f32.mrf.mxu1 }
  0xe7   :  { %v433_v41 = vmul.f32 %v703_v37, %v929_v35  ;;  %v441_v42 = vmul.f32 %v727_v38, %v929_v35 }
  0xe8   :  { %v705_v44 = vpop.f32.mrf.mxu0  ;;  %v729_v45 = vpop.f32.mrf.mxu1 }
  0xe9   :  { %v706_v46 = vadd.f32 %v705_v44, %v704_v39  ;;  %v730_v47 = vadd.f32 %v729_v45, %v728_v40  ;;  %v456_v50 = vadd.f32 %v936_v43, %v433_v41  ;;  %v464_v51 = vadd.f32 %v936_v43, %v441_v42 }
  0xea   :  { %v707_v48 = vpop.f32.mrf.mxu0  ;;  %v731_v49 = vpop.f32.mrf.mxu1 }
  0xeb   :  { %v434_v52 = vmul.f32 %v706_v46, %v929_v35  ;;  %v442_v53 = vmul.f32 %v730_v47, %v929_v35  ;;  %v472_v62 = vmax.f32 %v456_v50, 0.0  ;;  %v480_v63 = vmax.f32 %v464_v51, 0.0 }
  0xec   :  { %v708_v54 = vpop.f32.mrf.mxu0  ;;  %v732_v55 = vpop.f32.mrf.mxu1 }
  0xed   :  { %v457_v56 = vadd.f32 %v936_v43, %v434_v52  ;;  %v465_v57 = vadd.f32 %v936_v43, %v442_v53  ;;  %v709_v58 = vadd.f32 %v708_v54, %v707_v48  ;;  %v733_v59 = vadd.f32 %v732_v55, %v731_v49 }
  0xee   :  { %v710_v60 = vpop.f32.mrf.mxu0  ;;  %v734_v61 = vpop.f32.mrf.mxu1 }
  0xef   :  { %v473_v0 = vmax.f32 %v457_v56, 0.0  ;;  %v481_v1 = vmax.f32 %v465_v57, 0.0  ;;  %v435_v2 = vmul.f32 %v709_v58, %v929_v35  ;;  %v443_v3 = vmul.f32 %v733_v59, %v929_v35 }
  0xf0   :  { %v711_v4 = vpop.f32.mrf.mxu0  ;;  %v735_v5 = vpop.f32.mrf.mxu1 }
  0xf1   :  { %v641_v6 = vpack.c.bf16 %v473_v0, %v472_v62  ;;  %v661_v7 = vpack.c.bf16 %v481_v1, %v480_v63  ;;  %v712_v8 = vadd.f32 %v711_v4, %v710_v60  ;;  %v736_v9 = vadd.f32 %v735_v5, %v734_v61 }
  0xf2   :  { %v713_v10 = vpop.f32.mrf.mxu0  ;;  %v737_v11 = vpop.f32.mrf.mxu1  ;;  %v458_v12 = vadd.f32 %v936_v43, %v435_v2  ;;  %v466_v13 = vadd.f32 %v936_v43, %v443_v3 }
  0xf3   :  { %642 = vst [vmem:[%s996_s4] sm:$0xff] %v641_v6   ;;  %681 = vst [vmem:[%s996_s4 + $0x20] sm:$0xff] %v661_v7   ;;  %v436_v14 = vmul.f32 %v712_v8, %v929_v35  ;;  %v444_v15 = vmul.f32 %v736_v9, %v929_v35 }
  0xf4   :  { %v714_v16 = vpop.f32.mrf.mxu0  ;;  %v738_v17 = vpop.f32.mrf.mxu1  ;;  %v474_v26 = vmax.f32 %v458_v12, 0.0  ;;  %v482_v27 = vmax.f32 %v466_v13, 0.0 }
  0xf5   :  { %v715_v18 = vadd.f32 %v714_v16, %v713_v10  ;;  %v739_v19 = vadd.f32 %v738_v17, %v737_v11  ;;  %v459_v20 = vadd.f32 %v936_v43, %v436_v14  ;;  %v467_v21 = vadd.f32 %v936_v43, %v444_v15 }
  0xf6   :  { %v716_v22 = vpop.f32.mrf.mxu0  ;;  %v740_v23 = vpop.f32.mrf.mxu1 }
  0xf7   :  { %v437_v24 = vmul.f32 %v715_v18, %v929_v35  ;;  %v445_v25 = vmul.f32 %v739_v19, %v929_v35  ;;  %v475_v28 = vmax.f32 %v459_v20, 0.0  ;;  %v483_v29 = vmax.f32 %v467_v21, 0.0 }
  0xf8   :  { %v717_v30 = vpop.f32.mrf.mxu0  ;;  %v741_v31 = vpop.f32.mrf.mxu1 }
  0xf9   :  { %v718_v32 = vadd.f32 %v717_v30, %v716_v22  ;;  %v742_v33 = vadd.f32 %v741_v31, %v740_v23  ;;  %v646_v34 = vpack.c.bf16 %v475_v28, %v474_v26  ;;  %v666_v36 = vpack.c.bf16 %v483_v29, %v482_v27 }
  0xfa   :  { %v719_v37 = vpop.f32.mrf.mxu0  ;;  %v743_v38 = vpop.f32.mrf.mxu1  ;;  %v460_v39 = vadd.f32 %v936_v43, %v437_v24  ;;  %v468_v40 = vadd.f32 %v936_v43, %v445_v25 }
  0xfb   :  { %v438_v41 = vmul.f32 %v718_v32, %v929_v35  ;;  %v446_v42 = vmul.f32 %v742_v33, %v929_v35  ;;  %678 = vst [vmem:[%s996_s4 + $0x8] sm:$0xff] %v646_v34   ;;  %682 = vst [vmem:[%s996_s4 + $0x28] sm:$0xff] %v666_v36  }
  0xfc   :  { %v720_v44 = vpop.f32.mrf.mxu0  ;;  %v744_v45 = vpop.f32.mrf.mxu1  ;;  %v476_v52 = vmax.f32 %v460_v39, 0.0  ;;  %v484_v53 = vmax.f32 %v468_v40, 0.0 }
  0xfd   :  { %v461_v46 = vadd.f32 %v936_v43, %v438_v41  ;;  %v469_v47 = vadd.f32 %v936_v43, %v446_v42  ;;  %v721_v48 = vadd.f32 %v720_v44, %v719_v37  ;;  %v745_v49 = vadd.f32 %v744_v45, %v743_v38 }
  0xfe   :  { %v722_v50 = vpop.f32.mrf.mxu0  ;;  %v746_v51 = vpop.f32.mrf.mxu1 }
  0xff   :  { %v477_v54 = vmax.f32 %v461_v46, 0.0  ;;  %v485_v55 = vmax.f32 %v469_v47, 0.0  ;;  %v439_v56 = vmul.f32 %v721_v48, %v929_v35  ;;  %v447_v57 = vmul.f32 %v745_v49, %v929_v35 }
 0x100   :  { %v723_v58 = vpop.f32.mrf.mxu0  ;;  %v747_v59 = vpop.f32.mrf.mxu1 }
 0x101   :  { %v651_v60 = vpack.c.bf16 %v477_v54, %v476_v52  ;;  %v671_v61 = vpack.c.bf16 %v485_v55, %v484_v53  ;;  %v724_v62 = vadd.f32 %v723_v58, %v722_v50  ;;  %v748_v63 = vadd.f32 %v747_v59, %v746_v51 }
 0x102   :  { %v462_v0 = vadd.f32 %v936_v43, %v439_v56  ;;  %v470_v1 = vadd.f32 %v936_v43, %v447_v57 }
 0x103   :  { %679 = vst [vmem:[%s996_s4 + $0x10] sm:$0xff] %v651_v60   ;;  %683 = vst [vmem:[%s996_s4 + $0x30] sm:$0xff] %v671_v61   ;;  %v440_v2 = vmul.f32 %v724_v62, %v929_v35  ;;  %v448_v3 = vmul.f32 %v748_v63, %v929_v35 }
 0x104   :  { %v478_v6 = vmax.f32 %v462_v0, 0.0  ;;  %v486_v7 = vmax.f32 %v470_v1, 0.0 }
 0x105   :  { %v463_v4 = vadd.f32 %v936_v43, %v440_v2  ;;  %v471_v5 = vadd.f32 %v936_v43, %v448_v3 }
 0x107   :  { %v479_v8 = vmax.f32 %v463_v4, 0.0  ;;  %v487_v9 = vmax.f32 %v471_v5, 0.0 }
 0x109   :  { %v656_v10 = vpack.c.bf16 %v479_v8, %v478_v6  ;;  %v676_v11 = vpack.c.bf16 %v487_v9, %v486_v7 }
 0x10b   :  { %680 = vst [vmem:[%s996_s4 + $0x18] sm:$0xff] %v656_v10   ;;  %684 = vst [vmem:[%s996_s4 + $0x38] sm:$0xff] %v676_v11  }

// kernel: facecnn_forward.8
= control target key start
LH: loop header
LB: loop body
LE: loop exit
PB: predicated region body
PF: predicated region fallthrough
CT: control target
= control target key end

     0   :  { %s500_s1 = inlined_call_operand.vmem [shape: bf16[256,128], index: 1, kind: input, shape index: {}]   ;;  %s501_s0 = inlined_call_operand.vmem [shape: bf16[32,256], index: 0, kind: input, shape index: {}]   ;;  %s502_s2 = inlined_call_operand.vmem [shape: f32[1,128], index: 2, kind: input, shape index: {}]   ;;  %s503_s3 = inlined_call_operand.vmem [shape: f32[1,128], index: 3, kind: input, shape index: {}]   ;;  %s504_s4 = inlined_call_operand.vmem [shape: bf16[32,128], index: 4, kind: output, shape index: {}]  }
   0x1   :  { %v381_v0 = vld [vmem:[%s500_s1 + $0x78] sm:$0xff]   ;;  %v383_v2 = vld [vmem:[%s500_s1 + $0x70] sm:$0xff]   ;;  %v385_v4 = vld [vmem:[%s500_s1 + $0x68] sm:$0xff]  }
   0x2   :  { %v382_v1 = vld [vmem:[%s500_s1 + $0x38] sm:$0xff]   ;;  %337 = vmatprep.subr.bf16.mxu0 %v381_v0  ;;  %365 = vmatprep.subr.bf16.mxu1 %v381_v0  ;;  %v384_v3 = vld [vmem:[%s500_s1 + $0x30] sm:$0xff]   ;;  %v386_v5 = vld [vmem:[%s500_s1 + $0x28] sm:$0xff]  }
   0x3   :  { %338 = vmatpush3.bf16.msra.mxu0 %v382_v1  ;;  %373 = vmatpush3.bf16.msra.mxu1 %v382_v1  ;;  %v387_v6 = vld [vmem:[%s500_s1 + $0x60] sm:$0xff]   ;;  %v389_v8 = vld [vmem:[%s500_s1 + $0x58] sm:$0xff]   ;;  %v391_v10 = vld [vmem:[%s500_s1 + $0x50] sm:$0xff]  }
   0x4   :  { %339 = vmatprep.subr.bf16.mxu0 %v383_v2  ;;  %366 = vmatprep.subr.bf16.mxu1 %v383_v2  ;;  %v388_v7 = vld [vmem:[%s500_s1 + $0x20] sm:$0xff]   ;;  %v390_v9 = vld [vmem:[%s500_s1 + $0x18] sm:$0xff]   ;;  %v392_v13 = vld [vmem:[%s500_s1 + $0x10] sm:$0xff]  }
   0x5   :  { %v399_v11 = vld [vmem:[%s501_s0 + $0x4] ss:$8 sps:$4 sm:$0xff]   ;;  %v402_v12 = vld [vmem:[%s501_s0 + $0x14] ss:$8 sps:$4 sm:$0xff]   ;;  %v397_v18 = vld [vmem:[%s501_s0] ss:$8 sps:$4 sm:$0xff]  }
   0x6   :  { %v393_v14 = vld [vmem:[%s500_s1 + $0x48] sm:$0xff]   ;;  %214 = vmatprep.mubr.bf16.mxu0 %v399_v11  ;;  %222 = vmatprep.mubr.bf16.mxu1 %v402_v12  ;;  %v395_v16 = vld [vmem:[%s500_s1 + $0x40] sm:$0xff]   ;;  %v400_v19 = vld [vmem:[%s501_s0 + $0x10] ss:$8 sps:$4 sm:$0xff]  }
   0x7   :  { %340 = vmatpush3.bf16.msra.mxu0 %v384_v3  ;;  %374 = vmatpush3.bf16.msra.mxu1 %v384_v3  ;;  %v394_v15 = vld [vmem:[%s500_s1 + $0x8] sm:$0xff]   ;;  %v396_v17 = vld [vmem:[%s500_s1] sm:$0xff]  }
   0x8   :  { %341 = vmatprep.subr.bf16.mxu0 %v385_v4  ;;  %367 = vmatprep.subr.bf16.mxu1 %v385_v4  ;;  %v316_v23 = vld [vmem:[%s502_s2] ss:$0 sm:$0xff] }
   0x9   :  { %v317_v31 = vld [vmem:[%s503_s3] ss:$0 sm:$0xff] }
   0xb   :  { %342 = vmatpush3.bf16.msra.mxu0 %v386_v5  ;;  %375 = vmatpush3.bf16.msra.mxu1 %v386_v5 }
   0xc   :  { %343 = vmatprep.subr.bf16.mxu0 %v387_v6  ;;  %368 = vmatprep.subr.bf16.mxu1 %v387_v6 }
   0xf   :  { %344 = vmatpush3.bf16.msra.mxu0 %v388_v7  ;;  %376 = vmatpush3.bf16.msra.mxu1 %v388_v7 }
  0x10   :  { %345 = vmatprep.subr.bf16.mxu0 %v389_v8  ;;  %369 = vmatprep.subr.bf16.mxu1 %v389_v8 }
  0x13   :  { %346 = vmatpush3.bf16.msra.mxu0 %v390_v9  ;;  %377 = vmatpush3.bf16.msra.mxu1 %v390_v9 }
  0x14   :  { %347 = vmatprep.subr.bf16.mxu0 %v391_v10  ;;  %370 = vmatprep.subr.bf16.mxu1 %v391_v10 }
  0x17   :  { %348 = vmatpush3.bf16.msra.mxu0 %v392_v13  ;;  %378 = vmatpush3.bf16.msra.mxu1 %v392_v13 }
  0x18   :  { %349 = vmatprep.subr.bf16.mxu0 %v393_v14  ;;  %371 = vmatprep.subr.bf16.mxu1 %v393_v14 }
  0x1b   :  { %350 = vmatpush3.bf16.msra.mxu0 %v394_v15  ;;  %379 = vmatpush3.bf16.msra.mxu1 %v394_v15 }
  0x1c   :  { %351 = vmatprep.subr.bf16.mxu0 %v395_v16  ;;  %372 = vmatprep.subr.bf16.mxu1 %v395_v16 }
  0x1f   :  { %352 = vmatpush3.bf16.msra.mxu0 %v396_v17  ;;  %380 = vmatpush3.bf16.msra.mxu1 %v396_v17 }
  0x22   :  { %215 = vmatmul.mubr.bf16.vlgmr.msra.gmra.mxu0 %v397_v18  ;;  %223 = vmatmul.mubr.bf16.vlgmr.msra.gmra.mxu1 %v400_v19 }
  0xe2   :  { %v353_v20 = vpop.f32.mrf.mxu0  ;;  %v359_v21 = vpop.f32.mrf.mxu1 }
  0xe4   :  { %v354_v22 = vpop.f32.mrf.mxu0  ;;  %v360_v24 = vpop.f32.mrf.mxu1 }
  0xe5   :  { %v355_v25 = vadd.f32 %v354_v22, %v353_v20  ;;  %v361_v26 = vadd.f32 %v360_v24, %v359_v21 }
  0xe6   :  { %v356_v27 = vpop.f32.mrf.mxu0  ;;  %v362_v28 = vpop.f32.mrf.mxu1 }
  0xe7   :  { %v253_v29 = vmul.f32 %v355_v25, %v316_v23  ;;  %v255_v30 = vmul.f32 %v361_v26, %v316_v23 }
  0xe8   :  { %v357_v32 = vpop.f32.mrf.mxu0  ;;  %v363_v33 = vpop.f32.mrf.mxu1 }
  0xe9   :  { %v358_v34 = vadd.f32 %v357_v32, %v356_v27  ;;  %v364_v35 = vadd.f32 %v363_v33, %v362_v28  ;;  %v264_v36 = vadd.f32 %v317_v31, %v253_v29  ;;  %v266_v37 = vadd.f32 %v317_v31, %v255_v30 }
  0xeb   :  { %v254_v38 = vmul.f32 %v358_v34, %v316_v23  ;;  %v256_v39 = vmul.f32 %v364_v35, %v316_v23  ;;  %v268_v42 = vmax.f32 %v264_v36, 0.0  ;;  %v270_v43 = vmax.f32 %v266_v37, 0.0 }
  0xed   :  { %v265_v40 = vadd.f32 %v317_v31, %v254_v38  ;;  %v267_v41 = vadd.f32 %v317_v31, %v256_v39 }
  0xef   :  { %v269_v44 = vmax.f32 %v265_v40, 0.0  ;;  %v271_v45 = vmax.f32 %v267_v41, 0.0 }
  0xf1   :  { %v329_v46 = vpack.c.bf16 %v269_v44, %v268_v42  ;;  %v334_v47 = vpack.c.bf16 %v271_v45, %v270_v43 }
  0xf3   :  { %330 = vst [vmem:[%s504_s4] sm:$0xff] %v329_v46   ;;  %336 = vst [vmem:[%s504_s4 + $0x8] sm:$0xff] %v334_v47  }

// kernel: facecnn_forward.9
= control target key start
LH: loop header
LB: loop body
LE: loop exit
PB: predicated region body
PF: predicated region fallthrough
CT: control target
= control target key end

     0   :  { %v482_v0 = vmov 0.0   ;;  %vm483_vm0 = vmmov 0   ;;  %s599_s1 = inlined_call_operand.vmem [shape: bf16[384,128], index: 1, kind: input, shape index: {}]   ;;  %s600_s0 = inlined_call_operand.vmem [shape: bf16[16,384], index: 0, kind: input, shape index: {}]   ;;  %s601_s2 = inlined_call_operand.vmem [shape: f32[1,128], index: 2, kind: input, shape index: {}]   ;;  %s602_s3 = inlined_call_operand.vmem [shape: f32[1,128], index: 3, kind: input, shape index: {}]   ;;  %s603_s4 = inlined_call_operand.vmem [shape: bf16[16,128], index: 4, kind: output, shape index: {}]  }
   0x1   :  { %432 = vmatprep.subr.bf16.mxu1 %v482_v0  ;;  %v454_v1 = vld [vmem:[%s599_s1 + $0x78] sm:$0xff]   ;;  %448 = vmatprep.mubr.msk.bf16.mxu1 %vm483_vm0, %v482_v0  ;;  %v457_v4 = vld [vmem:[%s599_s1 + $0x70] sm:$0xff]   ;;  %v460_v7 = vld [vmem:[%s599_s1 + $0x68] sm:$0xff]  }
   0x2   :  { %v455_v2 = vld [vmem:[%s599_s1 + $0xb8] sm:$0xff]   ;;  %401 = vmatprep.subr.bf16.mxu0 %v454_v1  ;;  %v458_v5 = vld [vmem:[%s599_s1 + $0xb0] sm:$0xff]   ;;  %v461_v8 = vld [vmem:[%s599_s1 + $0xa8] sm:$0xff]  }
   0x3   :  { %v456_v3 = vld [vmem:[%s599_s1 + $0x38] sm:$0xff]   ;;  %433 = vmatpush3.bf16.msra.mxu1 %v455_v2  ;;  %v459_v6 = vld [vmem:[%s599_s1 + $0x30] sm:$0xff]   ;;  %v462_v9 = vld [vmem:[%s599_s1 + $0x28] sm:$0xff]  }
   0x4   :  { %402 = vmatpush3.bf16.msra.mxu0 %v456_v3  ;;  %434 = vmatprep.subr.bf16.mxu1 %v482_v0  ;;  %v463_v10 = vld [vmem:[%s599_s1 + $0x60] sm:$0xff]   ;;  %v466_v13 = vld [vmem:[%s599_s1 + $0x58] sm:$0xff]   ;;  %v469_v16 = vld [vmem:[%s599_s1 + $0x50] sm:$0xff]  }
   0x5   :  { %403 = vmatprep.subr.bf16.mxu0 %v457_v4  ;;  %v464_v11 = vld [vmem:[%s599_s1 + $0xa0] sm:$0xff]   ;;  %v467_v14 = vld [vmem:[%s599_s1 + $0x98] sm:$0xff]   ;;  %v470_v17 = vld [vmem:[%s599_s1 + $0x90] sm:$0xff]  }
   0x6   :  { %v465_v12 = vld [vmem:[%s599_s1 + $0x20] sm:$0xff]   ;;  %v468_v15 = vld [vmem:[%s599_s1 + $0x18] sm:$0xff]   ;;  %v471_v18 = vld [vmem:[%s599_s1 + $0x10] sm:$0xff]  }
   0x7   :  { %435 = vmatpush3.bf16.msra.mxu1 %v458_v5  ;;  %v472_v19 = vld [vmem:[%s599_s1 + $0x48] sm:$0xff]   ;;  %v475_v22 = vld [vmem:[%s599_s1 + $0x40] sm:$0xff]  }
   0x8   :  { %404 = vmatpush3.bf16.msra.mxu0 %v459_v6  ;;  %436 = vmatprep.subr.bf16.mxu1 %v482_v0  ;;  %v473_v20 = vld [vmem:[%s599_s1 + $0x88] sm:$0xff]   ;;  %v480_v23 = vld [vmem:[%s600_s0 + $0x4] ss:$12 sps:$4 sm:$0xff]   ;;  %v390_v34 = vld [vmem:[%s601_s2] ss:$0 sm:$0xff] }
   0x9   :  { %405 = vmatprep.subr.bf16.mxu0 %v460_v7  ;;  %v474_v21 = vld [vmem:[%s599_s1 + $0x8] sm:$0xff]   ;;  %v476_v24 = vld [vmem:[%s599_s1 + $0x80] sm:$0xff]   ;;  %270 = vmatprep.mubr.bf16.mxu0 %v480_v23 }
   0xa   :  { %v477_v25 = vld [vmem:[%s599_s1] sm:$0xff]   ;;  %v481_v26 = vld [vmem:[%s600_s0 + $0x8] ss:$12 sps:$4 sm:$0xff]  }
   0xb   :  { %437 = vmatpush3.bf16.msra.mxu1 %v461_v8  ;;  %v478_v27 = vld [vmem:[%s600_s0] ss:$12 sps:$4 sm:$0xff]  }
   0xc   :  { %406 = vmatpush3.bf16.msra.mxu0 %v462_v9  ;;  %438 = vmatprep.subr.bf16.mxu1 %v482_v0  ;;  %v391_v41 = vld [vmem:[%s602_s3] ss:$0 sm:$0xff] }
   0xd   :  { %407 = vmatprep.subr.bf16.mxu0 %v463_v10 }
   0xf   :  { %439 = vmatpush3.bf16.msra.mxu1 %v464_v11 }
  0x10   :  { %408 = vmatpush3.bf16.msra.mxu0 %v465_v12  ;;  %440 = vmatprep.subr.bf16.mxu1 %v482_v0 }
  0x11   :  { %409 = vmatprep.subr.bf16.mxu0 %v466_v13 }
  0x13   :  { %441 = vmatpush3.bf16.msra.mxu1 %v467_v14 }
  0x14   :  { %410 = vmatpush3.bf16.msra.mxu0 %v468_v15  ;;  %442 = vmatprep.subr.bf16.mxu1 %v482_v0 }
  0x15   :  { %411 = vmatprep.subr.bf16.mxu0 %v469_v16 }
  0x17   :  { %443 = vmatpush3.bf16.msra.mxu1 %v470_v17 }
  0x18   :  { %412 = vmatpush3.bf16.msra.mxu0 %v471_v18  ;;  %444 = vmatprep.subr.bf16.mxu1 %v482_v0 }
  0x19   :  { %413 = vmatprep.subr.bf16.mxu0 %v472_v19 }
  0x1b   :  { %445 = vmatpush3.bf16.msra.mxu1 %v473_v20 }
  0x1c   :  { %414 = vmatpush3.bf16.msra.mxu0 %v474_v21  ;;  %446 = vmatprep.subr.bf16.mxu1 %v482_v0 }
  0x1d   :  { %415 = vmatprep.subr.bf16.mxu0 %v475_v22 }
  0x1f   :  { %447 = vmatpush3.bf16.msra.mxu1 %v476_v24 }
  0x20   :  { %416 = vmatpush3.bf16.msra.mxu0 %v477_v25 }
  0x22   :  { %449 = vmatmul.mubr.bf16.vlgmr.msra.gmra.mxu1 %v481_v26 }
  0x23   :  { %271 = vmatmul.mubr.bf16.vlgmr.msra.gmra.mxu0 %v478_v27 }
  0xe2   :  { %v313_v28 = vpop.f32.mrf.mxu1 }
  0xe3   :  { %v417_v29 = vpop.f32.mrf.mxu0 }
  0xe4   :  { %v450_v30 = vpop.f32.mrf.mxu1 }
  0xe5   :  { %v418_v31 = vpop.f32.mrf.mxu0 }
  0xe6   :  { %v419_v32 = vadd.f32 %v418_v31, %v417_v29  ;;  %v316_v33 = vpop.f32.mrf.mxu1 }
  0xe7   :  { %v420_v35 = vpop.f32.mrf.mxu0 }
  0xe8   :  { %v314_v36 = vadd.f32 %v419_v32, %v313_v28  ;;  %v451_v37 = vpop.f32.mrf.mxu1 }
  0xe9   :  { %v421_v38 = vpop.f32.mrf.mxu0 }
  0xea   :  { %v336_v39 = vmul.f32 %v390_v34, %v314_v36  ;;  %v422_v40 = vadd.f32 %v421_v38, %v420_v35 }
  0xec   :  { %v317_v42 = vadd.f32 %v422_v40, %v316_v33  ;;  %v345_v43 = vadd.f32 %v391_v41, %v336_v39 }
  0xee   :  { %v337_v44 = vmul.f32 %v390_v34, %v317_v42  ;;  %v347_v46 = vmax.f32 %v345_v43, 0.0 }
  0xf0   :  { %v346_v45 = vadd.f32 %v391_v41, %v337_v44 }
  0xf2   :  { %v348_v47 = vmax.f32 %v346_v45, 0.0 }
  0xf4   :  { %v399_v48 = vpack.c.bf16 %v348_v47, %v347_v46 }
  0xf6   :  { %400 = vst [vmem:[%s603_s4] sm:$0xff] %v399_v48  }

// kernel: facecnn_forward.10
= control target key start
LH: loop header
LB: loop body
LE: loop exit
PB: predicated region body
PF: predicated region fallthrough
CT: control target
= control target key end

     0   :  { %s1162_s15 = smov 0   ;;  %s1164_s16 = smov 0   ;;  %s1353_s0 = inlined_call_operand.vmem [shape: bf16[16,256], index: 0, kind: input, shape index: {}]   ;;  %s1354_s1 = inlined_call_operand.vmem [shape: bf16[256,512], index: 1, kind: input, shape index: {}]   ;;  %s1355_s2 = inlined_call_operand.vmem [shape: f32[1,512], index: 2, kind: input, shape index: {}]   ;;  %s1356_s3 = inlined_call_operand.vmem [shape: f32[1,512], index: 3, kind: input, shape index: {}]   ;;  %s1357_s4 = inlined_call_operand.vmem [shape: bf16[16,512], index: 4, kind: output, shape index: {}]  }
   0x1   :  { %s1166_s17 = smov 0   ;;  %s1168_s18 = smov 0  }
   0x2   :  { %s1170_s19 = smov 0  }
   0x3 LB: > { %s29_s20 = sadd.s32 1, %s1131_s18  ;;  %s948_s21 = sadd.s32 4294967295, %s1135_s19   ;;  %s1135_s19 = sphi %s1170_s19, %s14_s19   ;;  %s1131_s18 = sphi %s1168_s18, %s1362_s18   ;;  %s1127_s17 = sphi %s1166_s17, %s1361_s17   ;;  %s1123_s16 = sphi %s1164_s16, %s1360_s16   ;;  %s1119_s15 = sphi %s1162_s15, %s1359_s15  }
   0x4   : > { %p31_p0 = scmp.ge.s32.totalorder %s29_s20, 2  ;;  %p77_p1 = scmp.ne.s32.totalorder %s1123_s16, %s1119_s15 }
   0x5   : > { %p78_p2 = scmp.eq.s32.totalorder %s1135_s19, 0  ;;  %p161_p4 = scmp.eq.s32.totalorder %s948_s21, 1 }
   0x6   : > { %s1364_s20 = smov (%p31_p0, %s29_s20), 0  ;;  %s70_s23 = sadd.s32 1, %s1123_s16 }
   0x7   : > { %p79_p3 = por %p78_p2, %p77_p1  ;;  %s66_s22 = ssub.s32 %s1131_s18, %s1364_s20 }
   0x8   : > { %p68_p5 = scmp.eq.s32.totalorder %s66_s22, 0  ;;  %p1197_p6 = por %p161_p4, %p77_p1 }
   0x9   : > { %p952_p7 = scmp.ge.s32.totalorder %s1135_s19, 2 }
   0xa   : > { %s1202_s25 = scalar_select %p68_p5, %s1123_s16, %s70_s23  }
   0xb   : > { %198 = sbr.rel (%p952_p7) target bundleno = 36 (0x24), region = 20 }
  0x10   : > { %201 = sbr.rel (!%p79_p3) target bundleno = 36 (0x24), region = 24  ;;  %s203_s26 = sand.u32 (%p79_p3), 1, %s1123_s16  }
  0x11   : > { %s1002_s27 = sshll.u32 (%p79_p3), %s1131_s18, 3  ;;  %s953_s28 = sshll.u32 (%p79_p3), %s203_s26, 8 }
  0x12   : > { %s1210_s5 = scalar_lea.vmem (%p79_p3), %s1354_s1, %s1002_s27  ;;  %s1215_s6 = scalar_lea.vmem (%p79_p3), [#allocation3], %s953_s28 }
  0x13   : > { %v302_v0 = vld [vmem:[%s1210_s5] sm:$0xff] (%p79_p3)  ;;  %v304_v1 = vld [vmem:[%s1210_s5 + $0x10] sm:$0xff] (%p79_p3) }
  0x14   : > { %v306_v2 = vld [vmem:[%s1210_s5 + $0x20] sm:$0xff] (%p79_p3)  ;;  %303 = vst [vmem:[%s1215_s6] sm:$0xff] (%p79_p3), %v302_v0  ;;  %305 = vst [vmem:[%s1215_s6 + $0x8] sm:$0xff] (%p79_p3), %v304_v1  ;;  %v308_v3 = vld [vmem:[%s1210_s5 + $0x30] sm:$0xff] (%p79_p3) }
  0x15   : > { %307 = vst [vmem:[%s1215_s6 + $0x10] sm:$0xff] %v306_v2  ;;  %v310_v4 = vld [vmem:[%s1210_s5 + $0x40] sm:$0xff]  ;;  %v312_v5 = vld [vmem:[%s1210_s5 + $0x50] sm:$0xff]  ;;  %309 = vst [vmem:[%s1215_s6 + $0x18] sm:$0xff] %v308_v3 }
  0x16   : > { %311 = vst [vmem:[%s1215_s6 + $0x20] sm:$0xff] %v310_v4  ;;  %313 = vst [vmem:[%s1215_s6 + $0x28] sm:$0xff] %v312_v5  ;;  %v314_v6 = vld [vmem:[%s1210_s5 + $0x60] sm:$0xff]  ;;  %v316_v7 = vld [vmem:[%s1210_s5 + $0x70] sm:$0xff] }
  0x17   : > { %v318_v8 = vld [vmem:[%s1210_s5 + $0x80] sm:$0xff]  ;;  %315 = vst [vmem:[%s1215_s6 + $0x30] sm:$0xff] %v314_v6  ;;  %317 = vst [vmem:[%s1215_s6 + $0x38] sm:$0xff] %v316_v7  ;;  %v320_v9 = vld [vmem:[%s1210_s5 + $0x90] sm:$0xff] }
  0x18   : > { %319 = vst [vmem:[%s1215_s6 + $0x40] sm:$0xff] %v318_v8  ;;  %v322_v10 = vld [vmem:[%s1210_s5 + $0xa0] sm:$0xff]  ;;  %v324_v11 = vld [vmem:[%s1210_s5 + $0xb0] sm:$0xff]  ;;  %321 = vst [vmem:[%s1215_s6 + $0x48] sm:$0xff] %v320_v9 }
  0x19   : > { %323 = vst [vmem:[%s1215_s6 + $0x50] sm:$0xff] %v322_v10  ;;  %325 = vst [vmem:[%s1215_s6 + $0x58] sm:$0xff] %v324_v11  ;;  %v326_v12 = vld [vmem:[%s1210_s5 + $0xc0] sm:$0xff]  ;;  %v328_v13 = vld [vmem:[%s1210_s5 + $0xd0] sm:$0xff] }
  0x1a   : > { %v330_v14 = vld [vmem:[%s1210_s5 + $0xe0] sm:$0xff]  ;;  %327 = vst [vmem:[%s1215_s6 + $0x60] sm:$0xff] %v326_v12  ;;  %329 = vst [vmem:[%s1215_s6 + $0x68] sm:$0xff] %v328_v13  ;;  %v332_v15 = vld [vmem:[%s1210_s5 + $0xf0] sm:$0xff] }
  0x1b   : > { %331 = vst [vmem:[%s1215_s6 + $0x70] sm:$0xff] %v330_v14  ;;  %v334_v16 = vld [vmem:[%s1210_s5 + $0x100] sm:$0xff]  ;;  %v336_v17 = vld [vmem:[%s1210_s5 + $0x110] sm:$0xff]  ;;  %333 = vst [vmem:[%s1215_s6 + $0x78] sm:$0xff] %v332_v15 }
  0x1c   : > { %335 = vst [vmem:[%s1215_s6 + $0x80] sm:$0xff] %v334_v16  ;;  %337 = vst [vmem:[%s1215_s6 + $0x88] sm:$0xff] %v336_v17  ;;  %v338_v18 = vld [vmem:[%s1210_s5 + $0x120] sm:$0xff]  ;;  %v340_v19 = vld [vmem:[%s1210_s5 + $0x130] sm:$0xff] }
  0x1d   : > { %v342_v20 = vld [vmem:[%s1210_s5 + $0x140] sm:$0xff]  ;;  %339 = vst [vmem:[%s1215_s6 + $0x90] sm:$0xff] %v338_v18  ;;  %341 = vst [vmem:[%s1215_s6 + $0x98] sm:$0xff] %v340_v19  ;;  %v344_v21 = vld [vmem:[%s1210_s5 + $0x150] sm:$0xff] }
  0x1e   : > { %343 = vst [vmem:[%s1215_s6 + $0xa0] sm:$0xff] %v342_v20  ;;  %v346_v22 = vld [vmem:[%s1210_s5 + $0x160] sm:$0xff]  ;;  %v348_v23 = vld [vmem:[%s1210_s5 + $0x170] sm:$0xff]  ;;  %345 = vst [vmem:[%s1215_s6 + $0xa8] sm:$0xff] %v344_v21 }
  0x1f   : > { %347 = vst [vmem:[%s1215_s6 + $0xb0] sm:$0xff] %v346_v22  ;;  %349 = vst [vmem:[%s1215_s6 + $0xb8] sm:$0xff] %v348_v23  ;;  %v350_v24 = vld [vmem:[%s1210_s5 + $0x180] sm:$0xff]  ;;  %v352_v25 = vld [vmem:[%s1210_s5 + $0x190] sm:$0xff] }
  0x20   : > { %v354_v26 = vld [vmem:[%s1210_s5 + $0x1a0] sm:$0xff]  ;;  %351 = vst [vmem:[%s1215_s6 + $0xc0] sm:$0xff] %v350_v24  ;;  %353 = vst [vmem:[%s1215_s6 + $0xc8] sm:$0xff] %v352_v25  ;;  %v356_v27 = vld [vmem:[%s1210_s5 + $0x1b0] sm:$0xff] }
  0x21   : > { %355 = vst [vmem:[%s1215_s6 + $0xd0] sm:$0xff] %v354_v26  ;;  %v358_v28 = vld [vmem:[%s1210_s5 + $0x1c0] sm:$0xff]  ;;  %v360_v29 = vld [vmem:[%s1210_s5 + $0x1d0] sm:$0xff]  ;;  %357 = vst [vmem:[%s1215_s6 + $0xd8] sm:$0xff] %v356_v27 }
  0x22   : > { %359 = vst [vmem:[%s1215_s6 + $0xe0] sm:$0xff] %v358_v28  ;;  %361 = vst [vmem:[%s1215_s6 + $0xe8] sm:$0xff] %v360_v29  ;;  %v362_v30 = vld [vmem:[%s1210_s5 + $0x1e0] sm:$0xff]  ;;  %v364_v31 = vld [vmem:[%s1210_s5 + $0x1f0] sm:$0xff] }
  0x23   : > { %363 = vst [vmem:[%s1215_s6 + $0xf0] sm:$0xff] %v362_v30  ;;  %365 = vst [vmem:[%s1215_s6 + $0xf8] sm:$0xff] %v364_v31 }
  0x24 PF: > { %p956_p8 = scmp.ge.s32.totalorder %s1135_s19, 1  ;;  %p386_p9 = scmp.lt.s32.totalorder %s1135_s19, 3 }
  0x26   : > { %p387_p10 = pnand %p956_p8, %p386_p9 }
  0x27   : > { %s393_s7 = sand.u32 (!%p387_p10), 1, %s1119_s15   ;;  %s959_s14 = sshll.u32 (!%p387_p10), %s1127_s17, 1 }
  0x28   : > { %390 = sbr.rel (%p387_p10) target bundleno = 326 (0x146), region = 70  ;;  %s957_s8 = sshll.u32 (!%p387_p10), %s393_s7, 8 }
  0x29   : > { %s1286_s11 = scalar_lea.vmem (!%p387_p10), [#allocation3], %s957_s8  ;;  %p450_p11 = scmp.lt.s32.totalorder (!%p387_p10), %s959_s14, 3 }
  0x2a   : > { %s958_s29 = sshll.u32 (!%p387_p10), %s393_s7, 4 }
  0x2b   : > { %s434_s30 = scalar_lea.vmem (!%p387_p10), [#allocation4], %s958_s29 }
  0x2d   : > { %v1096_v32 = vld [vmem:[%s1353_s0 + $0x4] ss:$8 sps:$4 sm:$0xff]   ;;  %v1046_v33 = vld [vmem:[%s1286_s11 + $0x74] ss:$8 sps:$4 sm:$0xff]   ;;  %v1048_v34 = vld [vmem:[%s1286_s11 + $0x70] ss:$8 sps:$4 sm:$0xff]   ;;  %v737_v2 = vlaneseq }
  0x2e   : > { %709 = vmatprep.mubr.bf16.mxu0 %v1096_v32  ;;  %677 = vmatprep.subr.bf16.mxu0 %v1046_v33  ;;  %v1049_v35 = vld [vmem:[%s1286_s11 + $0x64] ss:$8 sps:$4 sm:$0xff]   ;;  %v1051_v36 = vld [vmem:[%s1286_s11 + $0x60] ss:$8 sps:$4 sm:$0xff]   ;;  %v1052_v37 = vld [vmem:[%s1286_s11 + $0x54] ss:$8 sps:$4 sm:$0xff]  }
  0x2f   : > { %678 = vmatpush1.bf16.msra.mxu0 %v1048_v34  ;;  %v1054_v38 = vld [vmem:[%s1286_s11 + $0x50] ss:$8 sps:$4 sm:$0xff]   ;;  %v1055_v39 = vld [vmem:[%s1286_s11 + $0x44] ss:$8 sps:$4 sm:$0xff]   ;;  %v1057_v40 = vld [vmem:[%s1286_s11 + $0x40] ss:$8 sps:$4 sm:$0xff]  }
  0x30   : > { %679 = vmatprep.subr.bf16.mxu0 %v1049_v35  ;;  %v1058_v41 = vld [vmem:[%s1286_s11 + $0x34] ss:$8 sps:$4 sm:$0xff]   ;;  %v1060_v42 = vld [vmem:[%s1286_s11 + $0x30] ss:$8 sps:$4 sm:$0xff]   ;;  %v1061_v43 = vld [vmem:[%s1286_s11 + $0x24] ss:$8 sps:$4 sm:$0xff]  }
  0x31   : > { %v1063_v44 = vld [vmem:[%s1286_s11 + $0x20] ss:$8 sps:$4 sm:$0xff]   ;;  %v1064_v45 = vld [vmem:[%s1286_s11 + $0x14] ss:$8 sps:$4 sm:$0xff]   ;;  %v1066_v46 = vld [vmem:[%s1286_s11 + $0x10] ss:$8 sps:$4 sm:$0xff]  }
  0x32   : > { %v1067_v47 = vld [vmem:[%s1286_s11 + $0x4] ss:$8 sps:$4 sm:$0xff]   ;;  %v1069_v48 = vld [vmem:[%s1286_s11] ss:$8 sps:$4 sm:$0xff]   ;;  %v1070_v49 = vld [vmem:[%s1286_s11 + $0xf4] ss:$8 sps:$4 sm:$0xff]  }
  0x33   : > { %680 = vmatpush1.bf16.msra.mxu0 %v1051_v36  ;;  %v1072_v50 = vld [vmem:[%s1286_s11 + $0xf0] ss:$8 sps:$4 sm:$0xff]   ;;  %v1073_v51 = vld [vmem:[%s1286_s11 + $0xe4] ss:$8 sps:$4 sm:$0xff]   ;;  %v1075_v52 = vld [vmem:[%s1286_s11 + $0xe0] ss:$8 sps:$4 sm:$0xff]  }
  0x34   : > { %681 = vmatprep.subr.bf16.mxu0 %v1052_v37  ;;  %v1076_v53 = vld [vmem:[%s1286_s11 + $0xd4] ss:$8 sps:$4 sm:$0xff]   ;;  %v1078_v54 = vld [vmem:[%s1286_s11 + $0xd0] ss:$8 sps:$4 sm:$0xff]   ;;  %v1079_v55 = vld [vmem:[%s1286_s11 + $0xc4] ss:$8 sps:$4 sm:$0xff]  }
  0x35   : > { %v1081_v56 = vld [vmem:[%s1286_s11 + $0xc0] ss:$8 sps:$4 sm:$0xff]   ;;  %v1082_v57 = vld [vmem:[%s1286_s11 + $0xb4] ss:$8 sps:$4 sm:$0xff]   ;;  %v1084_v58 = vld [vmem:[%s1286_s11 + $0xb0] ss:$8 sps:$4 sm:$0xff]  }
  0x36   : > { %v1085_v59 = vld [vmem:[%s1286_s11 + $0xa4] ss:$8 sps:$4 sm:$0xff]   ;;  %v1087_v60 = vld [vmem:[%s1286_s11 + $0xa0] ss:$8 sps:$4 sm:$0xff]   ;;  %v1088_v61 = vld [vmem:[%s1286_s11 + $0x94] ss:$8 sps:$4 sm:$0xff]  }
  0x37   : > { %682 = vmatpush1.bf16.msra.mxu0 %v1054_v38  ;;  %v1090_v62 = vld [vmem:[%s1286_s11 + $0x90] ss:$8 sps:$4 sm:$0xff]   ;;  %v1091_v63 = vld [vmem:[%s1286_s11 + $0x84] ss:$8 sps:$4 sm:$0xff]   ;;  %v1093_v0 = vld [vmem:[%s1286_s11 + $0x80] ss:$8 sps:$4 sm:$0xff]  }
  0x38   : > { %683 = vmatprep.subr.bf16.mxu0 %v1055_v39  ;;  %v1094_v1 = vld [vmem:[%s1353_s0] ss:$8 sps:$4 sm:$0xff]   ;;  %s1366_s14 = smov (!%p450_p11, %s959_s14), 3  ;;  %v738_v3 = vshrl.u32 %v737_v2, 7  ;;  %s1005_s15 = sshll.u32 (%p1197_p6), %s1127_s17, 3 }
  0x39   : > { %s452_s23 = scalar_lea.vmem %s1355_s2, %s1366_s14  ;;  %s457_s28 = scalar_lea.vmem %s1356_s3, %s1366_s14 }
  0x3a   : > { %v739_v4 = vsub.s32 0, %v738_v3  ;;  %v735_v5 = vld [vmem:[%s452_s23] sm:$0x3]  ;;  %v743_v6 = vsub.s32 1, %v738_v3  ;;  %s797_s7 = scalar_lea.vmem (%p1197_p6), %s1357_s4, %s1005_s15 }
  0x3b   : > { %684 = vmatpush1.bf16.msra.mxu0 %v1057_v40  ;;  %v751_v7 = vld [vmem:[%s457_s28] sm:$0x3] }
  0x3c   : > { %685 = vmatprep.subr.bf16.mxu0 %v1058_v41  ;;  %v740_v8 = vrot.slane %v735_v5, %v739_v4  ;;  %v756_v9 = vrot.slane %v751_v7, %v739_v4  ;;  %v744_v10 = vrot.slane %v735_v5, %v743_v6  ;;  %v760_v13 = vrot.slane %v751_v7, %v743_v6 }
  0x3f   : > { %686 = vmatpush1.bf16.msra.mxu0 %v1060_v42 }
  0x40   : > { %687 = vmatprep.subr.bf16.mxu0 %v1061_v43 }
  0x43   : > { %688 = vmatpush1.bf16.msra.mxu0 %v1063_v44 }
  0x44   : > { %689 = vmatprep.subr.bf16.mxu0 %v1064_v45 }
  0x47   : > { %690 = vmatpush1.bf16.msra.mxu0 %v1066_v46 }
  0x48   : > { %691 = vmatprep.subr.bf16.mxu0 %v1067_v47 }
  0x4b   : > { %692 = vmatpush1.bf16.msra.mxu0 %v1069_v48 }
  0x4c   : > { %693 = vmatprep.subr.bf16.mxu0 %v1070_v49 }
  0x4f   : > { %694 = vmatpush2.bf16.msra.mxu0 %v1072_v50 }
  0x50   : > { %695 = vmatprep.subr.bf16.mxu0 %v1073_v51 }
  0x53   : > { %696 = vmatpush2.bf16.msra.mxu0 %v1075_v52 }
  0x54   : > { %697 = vmatprep.subr.bf16.mxu0 %v1076_v53 }
  0x57   : > { %698 = vmatpush2.bf16.msra.mxu0 %v1078_v54 }
  0x58   : > { %699 = vmatprep.subr.bf16.mxu0 %v1079_v55 }
  0x5b   : > { %700 = vmatpush2.bf16.msra.mxu0 %v1081_v56 }
  0x5c   : > { %701 = vmatprep.subr.bf16.mxu0 %v1082_v57 }
  0x5f   : > { %702 = vmatpush2.bf16.msra.mxu0 %v1084_v58 }
  0x60   : > { %703 = vmatprep.subr.bf16.mxu0 %v1085_v59 }
  0x63   : > { %704 = vmatpush2.bf16.msra.mxu0 %v1087_v60 }
  0x64   : > { %705 = vmatprep.subr.bf16.mxu0 %v1088_v61 }
  0x67   : > { %706 = vmatpush2.bf16.msra.mxu0 %v1090_v62 }
  0x68   : > { %707 = vmatprep.subr.bf16.mxu0 %v1091_v63 }
  0x6b   : > { %708 = vmatpush2.bf16.msra.mxu0 %v1093_v0 }
  0x6e   : > { %710 = vmatmul.mubr.bf16.vlgmr.msra.gmra.mxu0 %v1094_v1 }
 0x12e   : > { %v711_v11 = vpop.f32.mrf.mxu0 }
 0x12f   : > { %v747_v12 = vmul.f32 %v740_v8, %v711_v11 }
 0x130   : > { %v713_v14 = vpop.f32.mrf.mxu0 }
 0x131   : > { %v763_v15 = vadd.f32 %v756_v9, %v747_v12  ;;  %v748_v16 = vmul.f32 %v744_v10, %v713_v14 }
 0x132   : > { %v715_v17 = vpop.f32.mrf.mxu0 }
 0x133   : > { %v764_v18 = vadd.f32 %v760_v13, %v748_v16  ;;  %v749_v19 = vmul.f32 %v740_v8, %v715_v17  ;;  %v767_v21 = vmax.f32 %v763_v15, 0.0 }
 0x134   : > { %v717_v20 = vpop.f32.mrf.mxu0 }
 0x135   : > { %v768_v22 = vmax.f32 %v764_v18, 0.0  ;;  %v765_v23 = vadd.f32 %v756_v9, %v749_v19  ;;  %v750_v24 = vmul.f32 %v744_v10, %v717_v20 }
 0x137   : > { %v1003_v25 = vpack.c.bf16 %v768_v22, %v767_v21  ;;  %v766_v26 = vadd.f32 %v760_v13, %v750_v24  ;;  %v769_v27 = vmax.f32 %v765_v23, 0.0 }
 0x139   : > { %783 = vst [vmem:[%s434_s30] sm:$0xff] %v1003_v25  ;;  %v770_v28 = vmax.f32 %v766_v26, 0.0  ;;  %791 = sbr.rel (!%p1197_p6) target bundleno = 326 (0x146), region = 86 }
 0x13b   : > { %v1004_v29 = vpack.c.bf16 %v770_v28, %v769_v27 }
 0x13d   : > { %784 = vst [vmem:[%s434_s30 + $0x8] sm:$0xff] %v1004_v29 }
 0x140   : > { %v828_v30 = vld [vmem:[%s434_s30] sm:$0xff] }
 0x141   : > { %829 = vst [vmem:[%s797_s7] sm:$0xff] %v828_v30 }
 0x144   : > { %v830_v31 = vld [vmem:[%s434_s30 + $0x8] sm:$0xff] }
 0x145   : > { %831 = vst [vmem:[%s797_s7 + $0x10] sm:$0xff] %v830_v31 }
 0x146 PF: > { %s14_s19 = sadd.s32 1, %s1135_s19   ;;  %s1359_s15 = smov %s1123_s16 }
 0x147   : > { %p11_p12 = scmp.ge.s32.totalorder %s14_s19, 4   ;;  %s1360_s16 = smov %s1202_s25 }
 0x148   : > { %s1361_s17 = smov %s1131_s18  ;;  %s1362_s18 = smov %s1364_s20 }
 0x149   :  { %13 = sbr.rel (!%p11_p12) target bundleno = 3 (0x3), region = 164 }

// kernel: facecnn_forward.11
= control target key start
LH: loop header
LB: loop body
LE: loop exit
PB: predicated region body
PF: predicated region fallthrough
CT: control target
= control target key end

     0   :  { %s686_s1 = inlined_call_operand.vmem [shape: bf16[512,128], index: 1, kind: input, shape index: {}]   ;;  %s687_s0 = inlined_call_operand.vmem [shape: bf16[16,512], index: 0, kind: input, shape index: {}]   ;;  %s688_s2 = inlined_call_operand.vmem [shape: f32[1,128], index: 2, kind: input, shape index: {}]   ;;  %s689_s3 = inlined_call_operand.vmem [shape: f32[1,128], index: 3, kind: input, shape index: {}]   ;;  %s690_s4 = inlined_call_operand.vmem [shape: f32[16,128], index: 4, kind: output, shape index: {}]  }
   0x1   :  { %v503_v0 = vld [vmem:[%s686_s1 + $0x78] sm:$0xff]   ;;  %v507_v4 = vld [vmem:[%s686_s1 + $0x70] sm:$0xff]   ;;  %v511_v8 = vld [vmem:[%s686_s1 + $0x68] sm:$0xff]  }
   0x2   :  { %v504_v1 = vld [vmem:[%s686_s1 + $0xf8] sm:$0xff]   ;;  %459 = vmatprep.subr.bf16.mxu0 %v503_v0  ;;  %v508_v5 = vld [vmem:[%s686_s1 + $0xf0] sm:$0xff]   ;;  %v512_v9 = vld [vmem:[%s686_s1 + $0xe8] sm:$0xff]  }
   0x3   :  { %v505_v2 = vld [vmem:[%s686_s1 + $0x38] sm:$0xff]   ;;  %481 = vmatprep.subr.bf16.mxu1 %v504_v1  ;;  %v509_v6 = vld [vmem:[%s686_s1 + $0x30] sm:$0xff]   ;;  %v513_v10 = vld [vmem:[%s686_s1 + $0x28] sm:$0xff]  }
   0x4   :  { %v506_v3 = vld [vmem:[%s686_s1 + $0xb8] sm:$0xff]   ;;  %460 = vmatpush3.bf16.msra.mxu0 %v505_v2  ;;  %v510_v7 = vld [vmem:[%s686_s1 + $0xb0] sm:$0xff]   ;;  %v514_v11 = vld [vmem:[%s686_s1 + $0xa8] sm:$0xff]  }
   0x5   :  { %482 = vmatpush3.bf16.msra.mxu1 %v506_v3  ;;  %461 = vmatprep.subr.bf16.mxu0 %v507_v4  ;;  %v515_v12 = vld [vmem:[%s686_s1 + $0x60] sm:$0xff]   ;;  %v519_v16 = vld [vmem:[%s686_s1 + $0x58] sm:$0xff]   ;;  %v523_v20 = vld [vmem:[%s686_s1 + $0x50] sm:$0xff]  }
   0x6   :  { %483 = vmatprep.subr.bf16.mxu1 %v508_v5  ;;  %v516_v13 = vld [vmem:[%s686_s1 + $0xe0] sm:$0xff]   ;;  %v520_v17 = vld [vmem:[%s686_s1 + $0xd8] sm:$0xff]   ;;  %v524_v21 = vld [vmem:[%s686_s1 + $0xd0] sm:$0xff]  }
   0x7   :  { %v517_v14 = vld [vmem:[%s686_s1 + $0x20] sm:$0xff]   ;;  %v521_v18 = vld [vmem:[%s686_s1 + $0x18] sm:$0xff]   ;;  %v525_v22 = vld [vmem:[%s686_s1 + $0x10] sm:$0xff]  }
   0x8   :  { %462 = vmatpush3.bf16.msra.mxu0 %v509_v6  ;;  %v518_v15 = vld [vmem:[%s686_s1 + $0xa0] sm:$0xff]   ;;  %v522_v19 = vld [vmem:[%s686_s1 + $0x98] sm:$0xff]   ;;  %v526_v23 = vld [vmem:[%s686_s1 + $0x90] sm:$0xff]  }
   0x9   :  { %484 = vmatpush3.bf16.msra.mxu1 %v510_v7  ;;  %463 = vmatprep.subr.bf16.mxu0 %v511_v8  ;;  %v527_v24 = vld [vmem:[%s686_s1 + $0x48] sm:$0xff]   ;;  %v531_v28 = vld [vmem:[%s686_s1 + $0x40] sm:$0xff]  }
   0xa   :  { %485 = vmatprep.subr.bf16.mxu1 %v512_v9  ;;  %v528_v25 = vld [vmem:[%s686_s1 + $0xc8] sm:$0xff]   ;;  %v532_v29 = vld [vmem:[%s686_s1 + $0xc0] sm:$0xff]  }
   0xb   :  { %v529_v26 = vld [vmem:[%s686_s1 + $0x8] sm:$0xff]   ;;  %v533_v30 = vld [vmem:[%s686_s1] sm:$0xff]  }
   0xc   :  { %464 = vmatpush3.bf16.msra.mxu0 %v513_v10  ;;  %v530_v27 = vld [vmem:[%s686_s1 + $0x88] sm:$0xff]   ;;  %v534_v31 = vld [vmem:[%s686_s1 + $0x80] sm:$0xff]  }
   0xd   :  { %486 = vmatpush3.bf16.msra.mxu1 %v514_v11  ;;  %465 = vmatprep.subr.bf16.mxu0 %v515_v12  ;;  %v535_v32 = vld [vmem:[%s687_s0] ss:$16 sps:$4 sm:$0xff]   ;;  %v537_v33 = vld [vmem:[%s687_s0 + $0x4] ss:$16 sps:$4 sm:$0xff]   ;;  %v538_v34 = vld [vmem:[%s687_s0 + $0x8] ss:$16 sps:$4 sm:$0xff]  }
   0xe   :  { %487 = vmatprep.subr.bf16.mxu1 %v516_v13  ;;  %v540_v35 = vld [vmem:[%s687_s0 + $0xc] ss:$16 sps:$4 sm:$0xff]   ;;  %338 = vmatprep.mubr.bf16.mxu0 %v537_v33  ;;  %v457_v43 = vld [vmem:[%s688_s2] ss:$0 sm:$0xff] }
   0xf   :  { %379 = vmatprep.mubr.bf16.mxu1 %v540_v35  ;;  %v458_v47 = vld [vmem:[%s689_s3] ss:$0 sm:$0xff] }
  0x10   :  { %466 = vmatpush3.bf16.msra.mxu0 %v517_v14 }
  0x11   :  { %488 = vmatpush3.bf16.msra.mxu1 %v518_v15  ;;  %467 = vmatprep.subr.bf16.mxu0 %v519_v16 }
  0x12   :  { %489 = vmatprep.subr.bf16.mxu1 %v520_v17 }
  0x14   :  { %468 = vmatpush3.bf16.msra.mxu0 %v521_v18 }
  0x15   :  { %490 = vmatpush3.bf16.msra.mxu1 %v522_v19  ;;  %469 = vmatprep.subr.bf16.mxu0 %v523_v20 }
  0x16   :  { %491 = vmatprep.subr.bf16.mxu1 %v524_v21 }
  0x18   :  { %470 = vmatpush3.bf16.msra.mxu0 %v525_v22 }
  0x19   :  { %492 = vmatpush3.bf16.msra.mxu1 %v526_v23  ;;  %471 = vmatprep.subr.bf16.mxu0 %v527_v24 }
  0x1a   :  { %493 = vmatprep.subr.bf16.mxu1 %v528_v25 }
  0x1c   :  { %472 = vmatpush3.bf16.msra.mxu0 %v529_v26 }
  0x1d   :  { %494 = vmatpush3.bf16.msra.mxu1 %v530_v27  ;;  %473 = vmatprep.subr.bf16.mxu0 %v531_v28 }
  0x1e   :  { %495 = vmatprep.subr.bf16.mxu1 %v532_v29 }
  0x20   :  { %474 = vmatpush3.bf16.msra.mxu0 %v533_v30 }
  0x21   :  { %496 = vmatpush3.bf16.msra.mxu1 %v534_v31 }
  0x23   :  { %339 = vmatmul.mubr.bf16.vlgmr.msra.gmra.mxu0 %v535_v32 }
  0x24   :  { %380 = vmatmul.mubr.bf16.vlgmr.msra.gmra.mxu1 %v538_v34 }
  0xe3   :  { %v475_v36 = vpop.f32.mrf.mxu0 }
  0xe4   :  { %v497_v37 = vpop.f32.mrf.mxu1 }
  0xe5   :  { %v476_v38 = vpop.f32.mrf.mxu0 }
  0xe6   :  { %v477_v39 = vadd.f32 %v476_v38, %v475_v36  ;;  %v498_v40 = vpop.f32.mrf.mxu1 }
  0xe7   :  { %v499_v41 = vadd.f32 %v498_v40, %v497_v37  ;;  %v478_v42 = vpop.f32.mrf.mxu0 }
  0xe8   :  { %v500_v44 = vpop.f32.mrf.mxu1 }
  0xe9   :  { %v382_v45 = vadd.f32 %v499_v41, %v477_v39  ;;  %v479_v46 = vpop.f32.mrf.mxu0 }
  0xea   :  { %v480_v48 = vadd.f32 %v479_v46, %v478_v42  ;;  %v501_v49 = vpop.f32.mrf.mxu1 }
  0xeb   :  { %v404_v50 = vmul.f32 %v457_v43, %v382_v45  ;;  %v502_v51 = vadd.f32 %v501_v49, %v500_v44 }
  0xed   :  { %v413_v52 = vadd.f32 %v458_v47, %v404_v50  ;;  %v385_v53 = vadd.f32 %v502_v51, %v480_v48 }
  0xef   :  { %415 = vst [vmem:[%s690_s4] sm:$0xff] %v413_v52  ;;  %v405_v54 = vmul.f32 %v457_v43, %v385_v53 }
  0xf1   :  { %v414_v55 = vadd.f32 %v458_v47, %v405_v54 }
  0xf3   :  { %416 = vst [vmem:[%s690_s4 + $0x8] sm:$0xff] %v414_v55 }

</bundles_post_ra>
